<compile_context>
chip_gen: v5e
topology: v5e:2x2
jax: 0.10.0
libtpu: 0.0.40
codegen_flags: <defaults>
</compile_context>

<pallas_src>
import functools

import jax
import jax.numpy as jnp
from jax.experimental import pallas as pl
from jax.experimental.pallas import tpu as pltpu

COMPUTE_DTYPE = jnp.bfloat16        # MXU operand / inter-layer activation dtype
TM_MAX = 256                        # row-tile size (fits v5e/v6e/v7x VMEM budgets)
VMEM_LIMIT = 32 * 1024 * 1024
BN_EPS = 1e-5
LRELU_SLOPE = 0.2


def _round_up(x, m):
    return (x + m - 1) // m * m


def _tile_m(M):
    # Multiple of 16 so bf16 (16,128) sublane packing is always legal.
    return min(TM_MAX, _round_up(M, 16))


# ----------------------------------------------------------------------------
# Pallas kernels
# ----------------------------------------------------------------------------
def _gmm_bias_act_kernel(x_ref, w_ref, b_ref, o_ref, *, act):
    """Grouped matmul: o[g] = act(x[g] @ w[g] + b[g]).  Blocks carry a size-1 g dim."""
    acc = jnp.dot(x_ref[0], w_ref[0], preferred_element_type=jnp.float32)
    acc = acc + b_ref[0]
    if act == "leaky_relu":
        acc = jnp.where(acc >= 0.0, acc, LRELU_SLOPE * acc)
    elif act == "relu":
        acc = jnp.maximum(acc, 0.0)
    elif act == "tanh":
        acc = jnp.tanh(acc)
    o_ref[0] = acc.astype(o_ref.dtype)


def grouped_matmul_bias_act(x_gmk, w_gkn, b_g1n, act, out_dtype=jnp.float32):
    """(G,M,K) @ (G,K,N) + b, fused activation, M tiled, weights resident in VMEM."""
    G, M, K = x_gmk.shape
    N = w_gkn.shape[2]
    TM = _tile_m(M)
    return pl.pallas_call(
        functools.partial(_gmm_bias_act_kernel, act=act),
        out_shape=jax.ShapeDtypeStruct((G, M, N), out_dtype),
        grid=(G, pl.cdiv(M, TM)),
        in_specs=[
            pl.BlockSpec((1, TM, K), lambda g, i: (g, i, 0)),
            pl.BlockSpec((1, K, N), lambda g, i: (g, 0, 0)),   # resident per group
            pl.BlockSpec((1, 1, N), lambda g, i: (g, 0, 0)),
        ],
        out_specs=pl.BlockSpec((1, TM, N), lambda g, i: (g, i, 0)),
        compiler_params=pltpu.CompilerParams(
            dimension_semantics=("parallel", "parallel"),
            vmem_limit_bytes=VMEM_LIMIT),
    )(x_gmk, w_gkn, b_g1n)


def _mm_bias_stats_kernel(x_ref, w_ref, b_ref, o_ref, sum_ref, sq_ref, *, M, TM):
    """y = x @ w + b, plus per-channel sum / sum-of-squares accumulated over the grid."""
    i = pl.program_id(0)
    y = jnp.dot(x_ref[...], w_ref[...], preferred_element_type=jnp.float32)
    y = y + b_ref[...]
    o_ref[...] = y

    @pl.when(i == 0)
    def _():
        sum_ref[...] = jnp.zeros_like(sum_ref)
        sq_ref[...] = jnp.zeros_like(sq_ref)

    # Mask grid-tail rows so they never pollute the batch statistics.
    row = jax.lax.broadcasted_iota(jnp.int32, y.shape, 0) + i * TM
    yv = jnp.where(row < M, y, 0.0)
    sum_ref[...] += jnp.sum(yv, axis=0, keepdims=True)
    sq_ref[...] += jnp.sum(yv * yv, axis=0, keepdims=True)


def matmul_bias_with_stats(x_mk, w_kn, b_1n):
    M, K = x_mk.shape
    N = w_kn.shape[1]
    TM = _tile_m(M)
    return pl.pallas_call(
        functools.partial(_mm_bias_stats_kernel, M=M, TM=TM),
        out_shape=(jax.ShapeDtypeStruct((M, N), jnp.float32),
                   jax.ShapeDtypeStruct((1, N), jnp.float32),
                   jax.ShapeDtypeStruct((1, N), jnp.float32)),
        grid=(pl.cdiv(M, TM),),
        in_specs=[
            pl.BlockSpec((TM, K), lambda i: (i, 0)),
            pl.BlockSpec((K, N), lambda i: (0, 0)),            # resident weight
            pl.BlockSpec((1, N), lambda i: (0, 0)),
        ],
        out_specs=(
            pl.BlockSpec((TM, N), lambda i: (i, 0)),
            pl.BlockSpec((1, N), lambda i: (0, 0)),            # sum accumulator
            pl.BlockSpec((1, N), lambda i: (0, 0)),            # sum-of-squares accumulator
        ),
        compiler_params=pltpu.CompilerParams(
            dimension_semantics=("arbitrary",),                # accumulator outputs over M
            vmem_limit_bytes=VMEM_LIMIT),
    )(x_mk, w_kn, b_1n)


def _scale_shift_lrelu_kernel(x_ref, scale_ref, shift_ref, o_ref):
    y = x_ref[...] * scale_ref[...] + shift_ref[...]
    o_ref[...] = jnp.where(y >= 0.0, y, LRELU_SLOPE * y).astype(o_ref.dtype)


def bn_apply_leakyrelu(y_mk, scale_1n, shift_1n, out_dtype):
    M, N = y_mk.shape
    TM = _tile_m(M)
    return pl.pallas_call(
        _scale_shift_lrelu_kernel,
        out_shape=jax.ShapeDtypeStruct((M, N), out_dtype),
        grid=(pl.cdiv(M, TM),),
        in_specs=[
            pl.BlockSpec((TM, N), lambda i: (i, 0)),
            pl.BlockSpec((1, N), lambda i: (0, 0)),
            pl.BlockSpec((1, N), lambda i: (0, 0)),
        ],
        out_specs=pl.BlockSpec((TM, N), lambda i: (i, 0)),
        compiler_params=pltpu.CompilerParams(
            dimension_semantics=("parallel",),
            vmem_limit_bytes=VMEM_LIMIT),
    )(y_mk, scale_1n, shift_1n)


# ----------------------------------------------------------------------------
# Glue: patch extraction (plain JAX slices; fused by XLA with the bf16 cast)
# ----------------------------------------------------------------------------
def extract_patches(x_nhwc, k, stride, pad):
    """im2col; last-dim ordering is (kh, kw, cin)."""
    if pad:
        x_nhwc = jnp.pad(x_nhwc, ((0, 0), (pad, pad), (pad, pad), (0, 0)))
    _, Hp, Wp, _ = x_nhwc.shape
    Ho = (Hp - k) // stride + 1
    Wo = (Wp - k) // stride + 1
    cols = []
    for kh in range(k):
        for kw in range(k):
            cols.append(x_nhwc[:, kh:kh + stride * Ho:stride, kw:kw + stride * Wo:stride, :])
    return jnp.concatenate(cols, axis=-1)


def conv2d(x_nhwc, w_1kn, b_11n, k, stride, pad, act, out_dtype):
    patches = extract_patches(x_nhwc.astype(COMPUTE_DTYPE), k, stride, pad)
    N, Ho, Wo, K = patches.shape
    out = grouped_matmul_bias_act(patches.reshape(1, N * Ho * Wo, K),
                                  w_1kn, b_11n, act, out_dtype)
    return out.reshape(N, Ho, Wo, -1)


def conv2d_bn_stats(x_nhwc, w_kn, b_1n, k, stride, pad):
    # TODO(synk): replace im2col for this Cin>=64 layer with a direct tap-reduction
    # (manual halo DMA) so the 16x patch matrix is never materialized in HBM.
    patches = extract_patches(x_nhwc.astype(COMPUTE_DTYPE), k, stride, pad)
    N, Ho, Wo, K = patches.shape
    y, s, sq = matmul_bias_with_stats(patches.reshape(N * Ho * Wo, K), w_kn, b_1n)
    return y, s, sq, (N, Ho, Wo)


def conv_transpose2d_subpixel(x_nhwc, w_g, b_g, act, out_channels, out_dtype):
    """ConvTranspose2d(k=4, s=2, p=1) via the 4-phase subpixel decomposition:
    out[:, 2i+r, 2j+c, :] = (2x2 stride-1 conv of x with phase (r,c) sub-kernel)[i, j]."""
    N, H, W, Cin = x_nhwc.shape
    xb = x_nhwc.astype(COMPUTE_DTYPE)
    xp = jnp.pad(xb, ((0, 0), (1, 1), (1, 1), (0, 0)))
    phase_patches = []
    for r in range(2):
        for c in range(2):
            win = xp[:, r:r + H + 1, c:c + W + 1, :]
            phase_patches.append(extract_patches(win, 2, 1, 0).reshape(N * H * W, 4 * Cin))
    x_g = jnp.stack(phase_patches, axis=0)                         # (4, M, 4*Cin)
    out = grouped_matmul_bias_act(x_g, w_g, b_g, act, out_dtype)   # (4, M, Np)
    Np = out.shape[-1]
    out = out.reshape(2, 2, N, H, W, Np).transpose(2, 3, 0, 4, 1, 5)
    out = out.reshape(N, 2 * H, 2 * W, Np)
    return out[..., :out_channels] if Np != out_channels else out


# ----------------------------------------------------------------------------
# One-time parameter preprocessing (hoisted out of the forward path)
# ----------------------------------------------------------------------------
_PHASE_TAPS = ((3, 1), (2, 0))   # original 4-tap index for (phase r/c, window offset a/b)


def preprocess_params(p):
    cd = COMPUTE_DTYPE

    def conv_weight(w_oihw):                       # (Cout, Cin, k, k) -> (1, k*k*Cin, Cout)
        cout = w_oihw.shape[0]
        return jnp.transpose(w_oihw, (2, 3, 1, 0)).reshape(1, -1, cout).astype(cd)

    def convT_weight(w_iohw, cout_pad):            # (Cin, Cout, 4, 4) -> (4, 4*Cin, Np)
        cin, cout = w_iohw.shape[0], w_iohw.shape[1]
        mats = []
        for r in range(2):
            for c in range(2):
                taps = [w_iohw[:, :, _PHASE_TAPS[r][a], _PHASE_TAPS[c][b]]
                        for a in range(2) for b in range(2)]       # each (Cin, Cout)
                mats.append(jnp.stack(taps, 0).reshape(4 * cin, cout))
        w = jnp.stack(mats, 0)                                     # (4, 4*Cin, Cout)
        if cout_pad > cout:
            w = jnp.pad(w, ((0, 0), (0, 0), (0, cout_pad - cout)))
        return w.astype(cd)

    def bias_g(b, g, cout_pad=0):
        if cout_pad > b.shape[0]:
            b = jnp.pad(b, (0, cout_pad - b.shape[0]))
        return jnp.tile(b.reshape(1, 1, -1), (g, 1, 1)).astype(jnp.float32)

    cout2 = p["wt2"].shape[1]
    cout2_p = _round_up(cout2, 64)                 # pad tiny channel count once (weights only)
    return {
        "w1": conv_weight(p["w1"]),
        "b1": bias_g(p["b1"], 1),
        "w2": jnp.transpose(p["w2"], (2, 3, 1, 0)).reshape(-1, p["w2"].shape[0]).astype(cd),
        "b2": p["b2"].reshape(1, -1).astype(jnp.float32),
        "gamma": p["gamma"].reshape(1, -1).astype(jnp.float32),
        "beta": p["beta"].reshape(1, -1).astype(jnp.float32),
        "wt1": convT_weight(p["wt1"], p["wt1"].shape[1]),
        "bt1": bias_g(p["bt1"], 4),
        "wt2": convT_weight(p["wt2"], cout2_p),
        "bt2": bias_g(p["bt2"], 4, cout2_p),
    }


# ----------------------------------------------------------------------------
# UNetGenerator forward (training-mode BatchNorm, matches the PyTorch module)
# ----------------------------------------------------------------------------
def unet_forward(x_nchw, pp, *, out_channels=3):
    x = jnp.transpose(x_nchw, (0, 2, 3, 1))                       # NCHW -> NHWC

    # encoder
    h = conv2d(x, pp["w1"], pp["b1"], k=4, stride=2, pad=1,
               act="leaky_relu", out_dtype=COMPUTE_DTYPE)
    y, s, sq, (N, Ho, Wo) = conv2d_bn_stats(h, pp["w2"], pp["b2"], k=4, stride=2, pad=1)

    # batch statistics from the fused accumulators (tiny per-channel vectors)
    m_tot = N * Ho * Wo
    mean = s / m_tot
    var = jnp.maximum(sq / m_tot - mean * mean, 0.0)
    scale = pp["gamma"] * jax.lax.rsqrt(var + BN_EPS)
    shift = pp["beta"] - mean * scale
    h = bn_apply_leakyrelu(y, scale, shift, out_dtype=COMPUTE_DTYPE)
    h = h.reshape(N, Ho, Wo, -1)

    # decoder (subpixel transpose convs)
    h = conv_transpose2d_subpixel(h, pp["wt1"], pp["bt1"], act="relu",
                                  out_channels=pp["wt1"].shape[2],
                                  out_dtype=COMPUTE_DTYPE)
    h = conv_transpose2d_subpixel(h, pp["wt2"], pp["bt2"], act="tanh",
                                  out_channels=out_channels, out_dtype=jnp.float32)
    return jnp.transpose(h, (0, 3, 1, 2))                         # NHWC -> NCHW


def init_params(key, in_channels=3, out_channels=3):
    ks = jax.random.split(key, 8)
    s = 0.05
    f32 = jnp.float32
    return {
        "w1": jax.random.normal(ks[0], (64, in_channels, 4, 4), f32) * s,
        "b1": jax.random.normal(ks[1], (64,), f32) * s,
        "w2": jax.random.normal(ks[2], (128, 64, 4, 4), f32) * s,
        "b2": jax.random.normal(ks[3], (128,), f32) * s,
        "gamma": jnp.ones((128,), f32),
        "beta": jnp.zeros((128,), f32),
        "wt1": jax.random.normal(ks[4], (128, 64, 4, 4), f32) * s,
        "bt1": jax.random.normal(ks[5], (64,), f32) * s,
        "wt2": jax.random.normal(ks[6], (64, out_channels, 4, 4), f32) * s,
        "bt2": jax.random.normal(ks[7], (out_channels,), f32) * s,
    }


# ----------------------------------------------------------------------------
# Pure-JAX f32 reference (lax convs) for correctness checking
# ----------------------------------------------------------------------------
def ref_forward(x, p):
    dn = ("NCHW", "OIHW", "NCHW")

    def conv(x, w, b, s, pad):
        y = jax.lax.conv_general_dilated(x, w, (s, s), [(pad, pad)] * 2,
                                         dimension_numbers=dn)
        return y + b.reshape(1, -1, 1, 1)

    def convT(x, w, b, s, pad, k=4):
        wf = jnp.flip(w, axis=(2, 3)).transpose(1, 0, 2, 3)
        y = jax.lax.conv_general_dilated(x, wf, (1, 1), [(k - 1 - pad,) * 2] * 2,
                                         lhs_dilation=(s, s), dimension_numbers=dn)
        return y + b.reshape(1, -1, 1, 1)

    h = conv(x, p["w1"], p["b1"], 2, 1)
    h = jnp.where(h >= 0, h, 0.2 * h)
    h = conv(h, p["w2"], p["b2"], 2, 1)
    mean = h.mean(axis=(0, 2, 3), keepdims=True)
    var = ((h - mean) ** 2).mean(axis=(0, 2, 3), keepdims=True)
    h = (h - mean) / jnp.sqrt(var + BN_EPS)
    h = h * p["gamma"].reshape(1, -1, 1, 1) + p["beta"].reshape(1, -1, 1, 1)
    h = jnp.where(h >= 0, h, 0.2 * h)
    h = convT(h, p["wt1"], p["bt1"], 2, 1)
    h = jnp.maximum(h, 0.0)
    h = convT(h, p["wt2"], p["bt2"], 2, 1)
    return jnp.tanh(h)


if __name__ == "__main__":
    key = jax.random.PRNGKey(0)
    kx, kp = jax.random.split(key)
    x = jax.random.normal(kx, (2, 3, 16, 16), jnp.float32)   # NCHW like PyTorch
    params = init_params(kp)
    pp = preprocess_params(params)        # one-time weight repacking (hoisted)

    out = jax.jit(unet_forward)(x, pp)
    out = jax.block_until_ready(out)
    assert out.shape == (2, 3, 16, 16)

    ref = ref_forward(x, params)
    err = float(jnp.max(jnp.abs(out - ref)))
    # bf16 MXU operands + bf16 inter-layer activations -> relaxed tolerance vs f32 ref
    assert err < 5e-2, err
    print("KERNEL_OK")
</pallas_src>

<mosaic_0001>
module attributes {stable_mosaic.version = 11 : i64} {
  func.func @_gmm_bias_act_kernel(%arg0: i32, %arg1: i32, %arg2: memref<1x128x48xbf16, #tpu.memory_space<vmem>>, %arg3: memref<1x48x64xbf16, #tpu.memory_space<vmem>>, %arg4: memref<1x1x64xf32, #tpu.memory_space<vmem>>, %arg5: memref<1x128x64xbf16, #tpu.memory_space<vmem>>) attributes {dimension_semantics = [#tpu.dimension_semantics<parallel>, #tpu.dimension_semantics<parallel>], iteration_bounds = array<i64: 1, 1>, scalar_prefetch = 0 : i64, scratch_operands = 0 : i64, tpu.core_type = #tpu.core_type<tc>, window_params = [{transform_indices = @transform_0, window_bounds = array<i64: 1, 128, 48>}, {transform_indices = @transform_1, window_bounds = array<i64: 1, 48, 64>}, {transform_indices = @transform_2, window_bounds = array<i64: 1, 1, 64>}, {transform_indices = @transform_3, window_bounds = array<i64: 1, 128, 64>}]} {
    %c0 = arith.constant 0 : index
    %c0_0 = arith.constant 0 : index
    %c0_1 = arith.constant 0 : index
    %0 = vector.load %arg2[%c0, %c0_0, %c0_1] : memref<1x128x48xbf16, #tpu.memory_space<vmem>>, vector<1x128x48xbf16>
    %1 = vector.shape_cast %0 : vector<1x128x48xbf16> to vector<128x48xbf16>
    %c0_2 = arith.constant 0 : index
    %c0_3 = arith.constant 0 : index
    %c0_4 = arith.constant 0 : index
    %2 = vector.load %arg3[%c0_2, %c0_3, %c0_4] : memref<1x48x64xbf16, #tpu.memory_space<vmem>>, vector<1x48x64xbf16>
    %3 = vector.shape_cast %2 : vector<1x48x64xbf16> to vector<48x64xbf16>
    %cst = arith.constant dense<0.000000e+00> : vector<128x64xf32>
    %4 = tpu.matmul %1, %3, %cst {dimension_numbers = #tpu.dot_dimension_numbers<[1], [0], [0], [1], [0, 0, 1, 1], [], []>} : vector<128x48xbf16>, vector<48x64xbf16>, vector<128x64xf32> -> vector<128x64xf32>
    %c0_5 = arith.constant 0 : index
    %c0_6 = arith.constant 0 : index
    %c0_7 = arith.constant 0 : index
    %5 = vector.load %arg4[%c0_5, %c0_6, %c0_7] : memref<1x1x64xf32, #tpu.memory_space<vmem>>, vector<1x1x64xf32>
    %6 = vector.shape_cast %5 : vector<1x1x64xf32> to vector<1x64xf32>
    %7 = vector.broadcast %6 : vector<1x64xf32> to vector<128x64xf32>
    %8 = arith.addf %4, %7 : vector<128x64xf32>
    %cst_8 = arith.constant 0.000000e+00 : f32
    %9 = vector.broadcast %cst_8 : f32 to vector<128x64xf32>
    %10 = arith.cmpf oge, %8, %9 : vector<128x64xf32>
    %cst_9 = arith.constant 2.000000e-01 : f32
    %11 = vector.broadcast %cst_9 : f32 to vector<128x64xf32>
    %12 = arith.mulf %11, %8 : vector<128x64xf32>
    %13 = arith.select %10, %8, %12 : vector<128x64xi1>, vector<128x64xf32>
    %14 = arith.truncf %13 : vector<128x64xf32> to vector<128x64xbf16>
    %c0_10 = arith.constant 0 : index
    %c0_11 = arith.constant 0 : index
    %c0_12 = arith.constant 0 : index
    %15 = vector.load %arg5[%c0_10, %c0_11, %c0_12] : memref<1x128x64xbf16, #tpu.memory_space<vmem>>, vector<1x128x64xbf16>
    %16 = vector.shape_cast %15 : vector<1x128x64xbf16> to vector<128x64xbf16>
    %17 = vector.shape_cast %14 : vector<128x64xbf16> to vector<1x128x64xbf16>
    tpu.vector_store %arg5[%c0_10, %c0_11, %c0_12], %17 {strides = array<i32>} : memref<1x128x64xbf16, #tpu.memory_space<vmem>>, vector<1x128x64xbf16>,
    return
  }
  func.func @transform_0(%arg0: i32, %arg1: i32) -> (i32, i32, i32) {
    %c0_i32 = arith.constant 0 : i32
    %c0_i32_0 = arith.constant 0 : i32
    return %arg0, %arg1, %c0_i32 : i32, i32, i32
  }
  func.func @transform_1(%arg0: i32, %arg1: i32) -> (i32, i32, i32) {
    %c0_i32 = arith.constant 0 : i32
    %c0_i32_0 = arith.constant 0 : i32
    %c0_i32_1 = arith.constant 0 : i32
    return %arg0, %c0_i32, %c0_i32_0 : i32, i32, i32
  }
  func.func @transform_2(%arg0: i32, %arg1: i32) -> (i32, i32, i32) {
    %c0_i32 = arith.constant 0 : i32
    %c0_i32_0 = arith.constant 0 : i32
    %c0_i32_1 = arith.constant 0 : i32
    return %arg0, %c0_i32, %c0_i32_0 : i32, i32, i32
  }
  func.func @transform_3(%arg0: i32, %arg1: i32) -> (i32, i32, i32) {
    %c0_i32 = arith.constant 0 : i32
    %c0_i32_0 = arith.constant 0 : i32
    return %arg0, %arg1, %c0_i32 : i32, i32, i32
  }
}

module attributes {stable_mosaic.version = 11 : i64} {
  func.func @_mm_bias_stats_kernel(%arg0: i32, %arg1: memref<32x1024xbf16, #tpu.memory_space<vmem>>, %arg2: memref<1024x128xbf16, #tpu.memory_space<vmem>>, %arg3: memref<1x128xf32, #tpu.memory_space<vmem>>, %arg4: memref<32x128xf32, #tpu.memory_space<vmem>>, %arg5: memref<1x128xf32, #tpu.memory_space<vmem>>, %arg6: memref<1x128xf32, #tpu.memory_space<vmem>>) attributes {dimension_semantics = [#tpu.dimension_semantics<arbitrary>], iteration_bounds = array<i64: 1>, scalar_prefetch = 0 : i64, scratch_operands = 0 : i64, tpu.core_type = #tpu.core_type<tc>, window_params = [{transform_indices = @transform_0, window_bounds = array<i64: 32, 1024>}, {pipeline_mode = #tpu.pipeline_mode<synchronous>, transform_indices = @transform_1, window_bounds = array<i64: 1024, 128>}, {pipeline_mode = #tpu.pipeline_mode<synchronous>, transform_indices = @transform_2, window_bounds = array<i64: 1, 128>}, {transform_indices = @transform_3, window_bounds = array<i64: 32, 128>}, {pipeline_mode = #tpu.pipeline_mode<synchronous>, transform_indices = @transform_4, window_bounds = array<i64: 1, 128>}, {pipeline_mode = #tpu.pipeline_mode<synchronous>, transform_indices = @transform_5, window_bounds = array<i64: 1, 128>}]} {
    %c0 = arith.constant 0 : index
    %c0_0 = arith.constant 0 : index
    %0 = vector.load %arg1[%c0, %c0_0] : memref<32x1024xbf16, #tpu.memory_space<vmem>>, vector<32x1024xbf16>
    %c0_1 = arith.constant 0 : index
    %c0_2 = arith.constant 0 : index
    %1 = vector.load %arg2[%c0_1, %c0_2] : memref<1024x128xbf16, #tpu.memory_space<vmem>>, vector<1024x128xbf16>
    %cst = arith.constant dense<0.000000e+00> : vector<32x128xf32>
    %2 = tpu.matmul %0, %1, %cst {dimension_numbers = #tpu.dot_dimension_numbers<[1], [0], [0], [1], [0, 0, 1, 1], [], []>} : vector<32x1024xbf16>, vector<1024x128xbf16>, vector<32x128xf32> -> vector<32x128xf32>
    %c0_3 = arith.constant 0 : index
    %c0_4 = arith.constant 0 : index
    %3 = vector.load %arg3[%c0_3, %c0_4] : memref<1x128xf32, #tpu.memory_space<vmem>>, vector<1x128xf32>
    %4 = vector.broadcast %3 : vector<1x128xf32> to vector<32x128xf32>
    %5 = arith.addf %2, %4 : vector<32x128xf32>
    %c0_5 = arith.constant 0 : index
    %c0_6 = arith.constant 0 : index
    %6 = vector.load %arg4[%c0_5, %c0_6] : memref<32x128xf32, #tpu.memory_space<vmem>>, vector<32x128xf32>
    tpu.vector_store %arg4[%c0_5, %c0_6], %5 {strides = array<i32>} : memref<32x128xf32, #tpu.memory_space<vmem>>, vector<32x128xf32>,
    %c0_i32 = arith.constant 0 : i32
    %7 = arith.cmpi eq, %arg0, %c0_i32 : i32
    %8 = arith.extui %7 : i1 to i32
    %c0_i32_7 = arith.constant 0 : i32
    %9 = arith.cmpi ne, %8, %c0_i32_7 : i32
    scf.if %9 {
      %cst_20 = arith.constant 0.000000e+00 : f32
      %29 = vector.broadcast %cst_20 : f32 to vector<1x128xf32>
      %c0_21 = arith.constant 0 : index
      %c0_22 = arith.constant 0 : index
      %30 = vector.load %arg5[%c0_21, %c0_22] : memref<1x128xf32, #tpu.memory_space<vmem>>, vector<1x128xf32>
      tpu.vector_store %arg5[%c0_21, %c0_22], %29 {strides = array<i32>} : memref<1x128xf32, #tpu.memory_space<vmem>>, vector<1x128xf32>,
      %cst_23 = arith.constant 0.000000e+00 : f32
      %31 = vector.broadcast %cst_23 : f32 to vector<1x128xf32>
      %c0_24 = arith.constant 0 : index
      %c0_25 = arith.constant 0 : index
      %32 = vector.load %arg6[%c0_24, %c0_25] : memref<1x128xf32, #tpu.memory_space<vmem>>, vector<1x128xf32>
      tpu.vector_store %arg6[%c0_24, %c0_25], %31 {strides = array<i32>} : memref<1x128xf32, #tpu.memory_space<vmem>>, vector<1x128xf32>,
    } else {
    }
    %10 = tpu.iota {dimensions = array<i32: 0>} : vector<32x128xi32>
    %c32_i32 = arith.constant 32 : i32
    %11 = arith.muli %arg0, %c32_i32 : i32
    %12 = vector.broadcast %11 : i32 to vector<32x128xi32>
    %13 = arith.addi %10, %12 : vector<32x128xi32>
    %c32_i32_8 = arith.constant 32 : i32
    %14 = vector.broadcast %c32_i32_8 : i32 to vector<32x128xi32>
    %15 = arith.cmpi slt, %13, %14 : vector<32x128xi32>
    %cst_9 = arith.constant 0.000000e+00 : f32
    %16 = vector.broadcast %cst_9 : f32 to vector<32x128xf32>
    %17 = arith.select %15, %5, %16 : vector<32x128xi1>, vector<32x128xf32>
    %c0_10 = arith.constant 0 : index
    %c0_11 = arith.constant 0 : index
    %18 = vector.load %arg5[%c0_10, %c0_11] : memref<1x128xf32, #tpu.memory_space<vmem>>, vector<1x128xf32>
    %cst_12 = arith.constant dense<0.000000e+00> : vector<128xf32>
    %19 = vector.multi_reduction <add>, %17, %cst_12 [0] : vector<32x128xf32> to vector<128xf32>
    %20 = vector.shape_cast %19 : vector<128xf32> to vector<1x128xf32>
    %21 = arith.addf %18, %20 : vector<1x128xf32>
    %c0_13 = arith.constant 0 : index
    %c0_14 = arith.constant 0 : index
    %22 = vector.load %arg5[%c0_13, %c0_14] : memref<1x128xf32, #tpu.memory_space<vmem>>, vector<1x128xf32>
    tpu.vector_store %arg5[%c0_13, %c0_14], %21 {strides = array<i32>} : memref<1x128xf32, #tpu.memory_space<vmem>>, vector<1x128xf32>,
    %c0_15 = arith.constant 0 : index
    %c0_16 = arith.constant 0 : index
    %23 = vector.load %arg6[%c0_15, %c0_16] : memref<1x128xf32, #tpu.memory_space<vmem>>, vector<1x128xf32>
    %24 = arith.mulf %17, %17 : vector<32x128xf32>
    %cst_17 = arith.constant dense<0.000000e+00> : vector<128xf32>
    %25 = vector.multi_reduction <add>, %24, %cst_17 [0] : vector<32x128xf32> to vector<128xf32>
    %26 = vector.shape_cast %25 : vector<128xf32> to vector<1x128xf32>
    %27 = arith.addf %23, %26 : vector<1x128xf32>
    %c0_18 = arith.constant 0 : index
    %c0_19 = arith.constant 0 : index
    %28 = vector.load %arg6[%c0_18, %c0_19] : memref<1x128xf32, #tpu.memory_space<vmem>>, vector<1x128xf32>
    tpu.vector_store %arg6[%c0_18, %c0_19], %27 {strides = array<i32>} : memref<1x128xf32, #tpu.memory_space<vmem>>, vector<1x128xf32>,
    return
  }
  func.func @transform_0(%arg0: i32) -> (i32, i32) {
    %c0_i32 = arith.constant 0 : i32
    %c0_i32_0 = arith.constant 0 : i32
    return %arg0, %c0_i32 : i32, i32
  }
  func.func @transform_1(%arg0: i32) -> (i32, i32) {
    %c0_i32 = arith.constant 0 : i32
    %c0_i32_0 = arith.constant 0 : i32
    %c0_i32_1 = arith.constant 0 : i32
    return %c0_i32, %c0_i32_0 : i32, i32
  }
  func.func @transform_2(%arg0: i32) -> (i32, i32) {
    %c0_i32 = arith.constant 0 : i32
    %c0_i32_0 = arith.constant 0 : i32
    %c0_i32_1 = arith.constant 0 : i32
    return %c0_i32, %c0_i32_0 : i32, i32
  }
  func.func @transform_3(%arg0: i32) -> (i32, i32) {
    %c0_i32 = arith.constant 0 : i32
    %c0_i32_0 = arith.constant 0 : i32
    return %arg0, %c0_i32 : i32, i32
  }
  func.func @transform_4(%arg0: i32) -> (i32, i32) {
    %c0_i32 = arith.constant 0 : i32
    %c0_i32_0 = arith.constant 0 : i32
    %c0_i32_1 = arith.constant 0 : i32
    return %c0_i32, %c0_i32_0 : i32, i32
  }
  func.func @transform_5(%arg0: i32) -> (i32, i32) {
    %c0_i32 = arith.constant 0 : i32
    %c0_i32_0 = arith.constant 0 : i32
    %c0_i32_1 = arith.constant 0 : i32
    return %c0_i32, %c0_i32_0 : i32, i32
  }
}

module attributes {stable_mosaic.version = 11 : i64} {
  func.func @_scale_shift_lrelu_kernel(%arg0: i32, %arg1: memref<32x128xf32, #tpu.memory_space<vmem>>, %arg2: memref<1x128xf32, #tpu.memory_space<vmem>>, %arg3: memref<1x128xf32, #tpu.memory_space<vmem>>, %arg4: memref<32x128xbf16, #tpu.memory_space<vmem>>) attributes {dimension_semantics = [#tpu.dimension_semantics<parallel>], iteration_bounds = array<i64: 1>, scalar_prefetch = 0 : i64, scratch_operands = 0 : i64, tpu.core_type = #tpu.core_type<tc>, window_params = [{transform_indices = @transform_0, window_bounds = array<i64: 32, 128>}, {pipeline_mode = #tpu.pipeline_mode<synchronous>, transform_indices = @transform_1, window_bounds = array<i64: 1, 128>}, {pipeline_mode = #tpu.pipeline_mode<synchronous>, transform_indices = @transform_2, window_bounds = array<i64: 1, 128>}, {transform_indices = @transform_3, window_bounds = array<i64: 32, 128>}]} {
    %c0 = arith.constant 0 : index
    %c0_0 = arith.constant 0 : index
    %0 = vector.load %arg1[%c0, %c0_0] : memref<32x128xf32, #tpu.memory_space<vmem>>, vector<32x128xf32>
    %c0_1 = arith.constant 0 : index
    %c0_2 = arith.constant 0 : index
    %1 = vector.load %arg2[%c0_1, %c0_2] : memref<1x128xf32, #tpu.memory_space<vmem>>, vector<1x128xf32>
    %2 = vector.broadcast %1 : vector<1x128xf32> to vector<32x128xf32>
    %3 = arith.mulf %0, %2 : vector<32x128xf32>
    %c0_3 = arith.constant 0 : index
    %c0_4 = arith.constant 0 : index
    %4 = vector.load %arg3[%c0_3, %c0_4] : memref<1x128xf32, #tpu.memory_space<vmem>>, vector<1x128xf32>
    %5 = vector.broadcast %4 : vector<1x128xf32> to vector<32x128xf32>
    %6 = arith.addf %3, %5 : vector<32x128xf32>
    %cst = arith.constant 0.000000e+00 : f32
    %7 = vector.broadcast %cst : f32 to vector<32x128xf32>
    %8 = arith.cmpf oge, %6, %7 : vector<32x128xf32>
    %cst_5 = arith.constant 2.000000e-01 : f32
    %9 = vector.broadcast %cst_5 : f32 to vector<32x128xf32>
    %10 = arith.mulf %9, %6 : vector<32x128xf32>
    %11 = arith.select %8, %6, %10 : vector<32x128xi1>, vector<32x128xf32>
    %12 = arith.truncf %11 : vector<32x128xf32> to vector<32x128xbf16>
    %c0_6 = arith.constant 0 : index
    %c0_7 = arith.constant 0 : index
    %13 = vector.load %arg4[%c0_6, %c0_7] : memref<32x128xbf16, #tpu.memory_space<vmem>>, vector<32x128xbf16>
    tpu.vector_store %arg4[%c0_6, %c0_7], %12 {strides = array<i32>} : memref<32x128xbf16, #tpu.memory_space<vmem>>, vector<32x128xbf16>,
    return
  }
  func.func @transform_0(%arg0: i32) -> (i32, i32) {
    %c0_i32 = arith.constant 0 : i32
    %c0_i32_0 = arith.constant 0 : i32
    return %arg0, %c0_i32 : i32, i32
  }
  func.func @transform_1(%arg0: i32) -> (i32, i32) {
    %c0_i32 = arith.constant 0 : i32
    %c0_i32_0 = arith.constant 0 : i32
    %c0_i32_1 = arith.constant 0 : i32
    return %c0_i32, %c0_i32_0 : i32, i32
  }
  func.func @transform_2(%arg0: i32) -> (i32, i32) {
    %c0_i32 = arith.constant 0 : i32
    %c0_i32_0 = arith.constant 0 : i32
    %c0_i32_1 = arith.constant 0 : i32
    return %c0_i32, %c0_i32_0 : i32, i32
  }
  func.func @transform_3(%arg0: i32) -> (i32, i32) {
    %c0_i32 = arith.constant 0 : i32
    %c0_i32_0 = arith.constant 0 : i32
    return %arg0, %c0_i32 : i32, i32
  }
}

module attributes {stable_mosaic.version = 11 : i64} {
  func.func @_gmm_bias_act_kernel(%arg0: i32, %arg1: i32, %arg2: memref<1x32x512xbf16, #tpu.memory_space<vmem>>, %arg3: memref<1x512x64xbf16, #tpu.memory_space<vmem>>, %arg4: memref<1x1x64xf32, #tpu.memory_space<vmem>>, %arg5: memref<1x32x64xbf16, #tpu.memory_space<vmem>>) attributes {dimension_semantics = [#tpu.dimension_semantics<parallel>, #tpu.dimension_semantics<parallel>], iteration_bounds = array<i64: 4, 1>, scalar_prefetch = 0 : i64, scratch_operands = 0 : i64, tpu.core_type = #tpu.core_type<tc>, window_params = [{transform_indices = @transform_0, window_bounds = array<i64: 1, 32, 512>}, {transform_indices = @transform_1, window_bounds = array<i64: 1, 512, 64>}, {transform_indices = @transform_2, window_bounds = array<i64: 1, 1, 64>}, {transform_indices = @transform_3, window_bounds = array<i64: 1, 32, 64>}]} {
    %c0 = arith.constant 0 : index
    %c0_0 = arith.constant 0 : index
    %c0_1 = arith.constant 0 : index
    %0 = vector.load %arg2[%c0, %c0_0, %c0_1] : memref<1x32x512xbf16, #tpu.memory_space<vmem>>, vector<1x32x512xbf16>
    %1 = vector.shape_cast %0 : vector<1x32x512xbf16> to vector<32x512xbf16>
    %c0_2 = arith.constant 0 : index
    %c0_3 = arith.constant 0 : index
    %c0_4 = arith.constant 0 : index
    %2 = vector.load %arg3[%c0_2, %c0_3, %c0_4] : memref<1x512x64xbf16, #tpu.memory_space<vmem>>, vector<1x512x64xbf16>
    %3 = vector.shape_cast %2 : vector<1x512x64xbf16> to vector<512x64xbf16>
    %cst = arith.constant dense<0.000000e+00> : vector<32x64xf32>
    %4 = tpu.matmul %1, %3, %cst {dimension_numbers = #tpu.dot_dimension_numbers<[1], [0], [0], [1], [0, 0, 1, 1], [], []>} : vector<32x512xbf16>, vector<512x64xbf16>, vector<32x64xf32> -> vector<32x64xf32>
    %c0_5 = arith.constant 0 : index
    %c0_6 = arith.constant 0 : index
    %c0_7 = arith.constant 0 : index
    %5 = vector.load %arg4[%c0_5, %c0_6, %c0_7] : memref<1x1x64xf32, #tpu.memory_space<vmem>>, vector<1x1x64xf32>
    %6 = vector.shape_cast %5 : vector<1x1x64xf32> to vector<1x64xf32>
    %7 = vector.broadcast %6 : vector<1x64xf32> to vector<32x64xf32>
    %8 = arith.addf %4, %7 : vector<32x64xf32>
    %cst_8 = arith.constant 0.000000e+00 : f32
    %9 = vector.broadcast %cst_8 : f32 to vector<32x64xf32>
    %10 = arith.maximumf %8, %9 : vector<32x64xf32>
    %11 = arith.truncf %10 : vector<32x64xf32> to vector<32x64xbf16>
    %c0_9 = arith.constant 0 : index
    %c0_10 = arith.constant 0 : index
    %c0_11 = arith.constant 0 : index
    %12 = vector.load %arg5[%c0_9, %c0_10, %c0_11] : memref<1x32x64xbf16, #tpu.memory_space<vmem>>, vector<1x32x64xbf16>
    %13 = vector.shape_cast %12 : vector<1x32x64xbf16> to vector<32x64xbf16>
    %14 = vector.shape_cast %11 : vector<32x64xbf16> to vector<1x32x64xbf16>
    tpu.vector_store %arg5[%c0_9, %c0_10, %c0_11], %14 {strides = array<i32>} : memref<1x32x64xbf16, #tpu.memory_space<vmem>>, vector<1x32x64xbf16>,
    return
  }
  func.func @transform_0(%arg0: i32, %arg1: i32) -> (i32, i32, i32) {
    %c0_i32 = arith.constant 0 : i32
    %c0_i32_0 = arith.constant 0 : i32
    return %arg0, %arg1, %c0_i32 : i32, i32, i32
  }
  func.func @transform_1(%arg0: i32, %arg1: i32) -> (i32, i32, i32) {
    %c0_i32 = arith.constant 0 : i32
    %c0_i32_0 = arith.constant 0 : i32
    %c0_i32_1 = arith.constant 0 : i32
    return %arg0, %c0_i32, %c0_i32_0 : i32, i32, i32
  }
  func.func @transform_2(%arg0: i32, %arg1: i32) -> (i32, i32, i32) {
    %c0_i32 = arith.constant 0 : i32
    %c0_i32_0 = arith.constant 0 : i32
    %c0_i32_1 = arith.constant 0 : i32
    return %arg0, %c0_i32, %c0_i32_0 : i32, i32, i32
  }
  func.func @transform_3(%arg0: i32, %arg1: i32) -> (i32, i32, i32) {
    %c0_i32 = arith.constant 0 : i32
    %c0_i32_0 = arith.constant 0 : i32
    return %arg0, %arg1, %c0_i32 : i32, i32, i32
  }
}

module attributes {stable_mosaic.version = 11 : i64} {
  func.func @_gmm_bias_act_kernel(%arg0: i32, %arg1: i32, %arg2: memref<1x128x256xbf16, #tpu.memory_space<vmem>>, %arg3: memref<1x256x64xbf16, #tpu.memory_space<vmem>>, %arg4: memref<1x1x64xf32, #tpu.memory_space<vmem>>, %arg5: memref<1x128x64xf32, #tpu.memory_space<vmem>>) attributes {dimension_semantics = [#tpu.dimension_semantics<parallel>, #tpu.dimension_semantics<parallel>], iteration_bounds = array<i64: 4, 1>, scalar_prefetch = 0 : i64, scratch_operands = 0 : i64, tpu.core_type = #tpu.core_type<tc>, window_params = [{transform_indices = @transform_0, window_bounds = array<i64: 1, 128, 256>}, {transform_indices = @transform_1, window_bounds = array<i64: 1, 256, 64>}, {transform_indices = @transform_2, window_bounds = array<i64: 1, 1, 64>}, {transform_indices = @transform_3, window_bounds = array<i64: 1, 128, 64>}]} {
    %c0 = arith.constant 0 : index
    %c0_0 = arith.constant 0 : index
    %c0_1 = arith.constant 0 : index
    %0 = vector.load %arg2[%c0, %c0_0, %c0_1] : memref<1x128x256xbf16, #tpu.memory_space<vmem>>, vector<1x128x256xbf16>
    %1 = vector.shape_cast %0 : vector<1x128x256xbf16> to vector<128x256xbf16>
    %c0_2 = arith.constant 0 : index
    %c0_3 = arith.constant 0 : index
    %c0_4 = arith.constant 0 : index
    %2 = vector.load %arg3[%c0_2, %c0_3, %c0_4] : memref<1x256x64xbf16, #tpu.memory_space<vmem>>, vector<1x256x64xbf16>
    %3 = vector.shape_cast %2 : vector<1x256x64xbf16> to vector<256x64xbf16>
    %cst = arith.constant dense<0.000000e+00> : vector<128x64xf32>
    %4 = tpu.matmul %1, %3, %cst {dimension_numbers = #tpu.dot_dimension_numbers<[1], [0], [0], [1], [0, 0, 1, 1], [], []>} : vector<128x256xbf16>, vector<256x64xbf16>, vector<128x64xf32> -> vector<128x64xf32>
    %c0_5 = arith.constant 0 : index
    %c0_6 = arith.constant 0 : index
    %c0_7 = arith.constant 0 : index
    %5 = vector.load %arg4[%c0_5, %c0_6, %c0_7] : memref<1x1x64xf32, #tpu.memory_space<vmem>>, vector<1x1x64xf32>
    %6 = vector.shape_cast %5 : vector<1x1x64xf32> to vector<1x64xf32>
    %7 = vector.broadcast %6 : vector<1x64xf32> to vector<128x64xf32>
    %8 = arith.addf %4, %7 : vector<128x64xf32>
    %9 = math.tanh %8 : vector<128x64xf32>
    %c0_8 = arith.constant 0 : index
    %c0_9 = arith.constant 0 : index
    %c0_10 = arith.constant 0 : index
    %10 = vector.load %arg5[%c0_8, %c0_9, %c0_10] : memref<1x128x64xf32, #tpu.memory_space<vmem>>, vector<1x128x64xf32>
    %11 = vector.shape_cast %10 : vector<1x128x64xf32> to vector<128x64xf32>
    %12 = vector.shape_cast %9 : vector<128x64xf32> to vector<1x128x64xf32>
    tpu.vector_store %arg5[%c0_8, %c0_9, %c0_10], %12 {strides = array<i32>} : memref<1x128x64xf32, #tpu.memory_space<vmem>>, vector<1x128x64xf32>,
    return
  }
  func.func @transform_0(%arg0: i32, %arg1: i32) -> (i32, i32, i32) {
    %c0_i32 = arith.constant 0 : i32
    %c0_i32_0 = arith.constant 0 : i32
    return %arg0, %arg1, %c0_i32 : i32, i32, i32
  }
  func.func @transform_1(%arg0: i32, %arg1: i32) -> (i32, i32, i32) {
    %c0_i32 = arith.constant 0 : i32
    %c0_i32_0 = arith.constant 0 : i32
    %c0_i32_1 = arith.constant 0 : i32
    return %arg0, %c0_i32, %c0_i32_0 : i32, i32, i32
  }
  func.func @transform_2(%arg0: i32, %arg1: i32) -> (i32, i32, i32) {
    %c0_i32 = arith.constant 0 : i32
    %c0_i32_0 = arith.constant 0 : i32
    %c0_i32_1 = arith.constant 0 : i32
    return %arg0, %c0_i32, %c0_i32_0 : i32, i32, i32
  }
  func.func @transform_3(%arg0: i32, %arg1: i32) -> (i32, i32, i32) {
    %c0_i32 = arith.constant 0 : i32
    %c0_i32_0 = arith.constant 0 : i32
    return %arg0, %arg1, %c0_i32 : i32, i32, i32
  }
}

</mosaic_0001>

<bundles_post_ra>
// kernel: unet_forward.5
= control target key start
LH: loop header
LB: loop body
LE: loop exit
PB: predicated region body
PF: predicated region fallthrough
CT: control target
= control target key end

     0   :  { %vm99_vm0 = vcmask 392192   ;;  %vm237_vm3 = vcmask 519168   ;;  %s477_s1 = inlined_call_operand.vmem [shape: bf16[1,48,64], index: 1, kind: input, shape index: {}]   ;;  %s478_s2 = inlined_call_operand.vmem [shape: f32[1,1,64], index: 2, kind: input, shape index: {}]   ;;  %s479_s0 = inlined_call_operand.vmem [shape: bf16[1,128,48], index: 0, kind: input, shape index: {}]   ;;  %s480_s3 = inlined_call_operand.vmem [shape: bf16[1,128,64], index: 3, kind: output, shape index: {}]  }
   0x1   :  { %v320_v0 = vld [vmem:[%s477_s1 + $0x10] sm:$0xff]  ;;  %v319_v1 = vld [vmem:[%s477_s1 + $0x8] sm:$0xff]  ;;  %v318_v2 = vld [vmem:[%s477_s1] sm:$0xff] }
   0x2   :  { %129 = vmatpush.bf16.msra.mxu0 %v320_v0  ;;  %321 = vmatpush.bf16.msra.mxu1 %v320_v0  ;;  %v310_v3 = vld [vmem:[%s479_s0] sm:$0xff]  ;;  %v312_v4 = vld [vmem:[%s479_s0 + $0x10] sm:$0xff]  ;;  %v311_v7 = vld [vmem:[%s479_s0 + $0x8] sm:$0xff] }
   0x3   :  { %322 = vmatpush.bf16.msra.mxu2 %v320_v0  ;;  %323 = vmatpush.bf16.msra.mxu3 %v320_v0  ;;  %v314_v5 = vld [vmem:[%s479_s0 + $0x20] sm:$0xff]  ;;  %v316_v6 = vld [vmem:[%s479_s0 + $0x30] sm:$0xff]  ;;  %v313_v8 = vld [vmem:[%s479_s0 + $0x18] sm:$0xff] }
   0x4   :  { %v315_v9 = vld [vmem:[%s479_s0 + $0x28] sm:$0xff]  ;;  %v317_v10 = vld [vmem:[%s479_s0 + $0x38] sm:$0xff]  ;;  %v395_v11 = vld [vmem:[%s478_s2] ss:$0 sm:$0xff] }
   0x6   :  { %130 = vmatpush.bf16.msra.mxu0 %v319_v1  ;;  %324 = vmatpush.bf16.msra.mxu1 %v319_v1 }
   0x7   :  { %325 = vmatpush.bf16.msra.mxu2 %v319_v1  ;;  %326 = vmatpush.bf16.msra.mxu3 %v319_v1 }
   0xa   :  { %131 = vmatpush.bf16.msra.mxu0 %v318_v2  ;;  %327 = vmatpush.bf16.msra.mxu1 %v318_v2 }
   0xb   :  { %328 = vmatpush.bf16.msra.mxu2 %v318_v2  ;;  %329 = vmatpush.bf16.msra.mxu3 %v318_v2 }
   0xd   :  { %302 = vmatmul.msk.bf16.vlgmr.msra.gmra.mxu0 %vm99_vm0, %v310_v3  ;;  %304 = vmatmul.msk.bf16.vlgmr.msra.gmra.mxu1 %vm99_vm0, %v312_v4 }
   0xe   :  { %306 = vmatmul.msk.bf16.vlgmr.msra.gmra.mxu2 %vm99_vm0, %v314_v5  ;;  %308 = vmatmul.msk.bf16.vlgmr.msra.gmra.mxu3 %vm99_vm0, %v316_v6 }
  0x1d   :  { %303 = vmatmul.msk.bf16.gmra.mxu0 %vm99_vm0, %v311_v7  ;;  %305 = vmatmul.msk.bf16.gmra.mxu1 %vm99_vm0, %v313_v8 }
  0x1e   :  { %307 = vmatmul.msk.bf16.gmra.mxu2 %vm99_vm0, %v315_v9  ;;  %309 = vmatmul.msk.bf16.gmra.mxu3 %vm99_vm0, %v317_v10 }
  0x8a   :  { %v133_v12 = vpop.f32.mrf.mxu0  ;;  %v143_v13 = vpop.f32.mrf.mxu1 }
  0x8b   :  { %v134_v14 = vadd.f32 %v395_v11, %v133_v12  ;;  %v144_v15 = vadd.f32 %v395_v11, %v143_v13 }
  0x8d   :  { %vm173_vm1 = vcmp.ge.f32.partialorder %v134_v14, 0.0  ;;  %v189_v16 = vmul.f32 0.2, %v134_v14  ;;  %vm177_vm2 = vcmp.ge.f32.partialorder %v144_v15, 0.0  ;;  %v193_v17 = vmul.f32 0.2, %v144_v15 }
  0x8f   :  { %v205_v18 = vsel %vm173_vm1, %v134_v14, %v189_v16  ;;  %v209_v19 = vsel %vm177_vm2, %v144_v15, %v193_v17 }
  0x90   :  { %v221_v20 = vpack.c.bf16 %v205_v18, %v205_v18  ;;  %v225_v21 = vpack.c.bf16 %v209_v19, %v209_v19 }
  0x91   :  { %v153_v22 = vpop.f32.mrf.mxu2  ;;  %v163_v23 = vpop.f32.mrf.mxu3 }
  0x92   :  { %238 = vst.msk [vmem:[%s480_s3] sm:$0xf] %vm237_vm3, %v221_v20  ;;  %v154_v24 = vadd.f32 %v395_v11, %v153_v22  ;;  %v164_v25 = vadd.f32 %v395_v11, %v163_v23  ;;  %v135_v26 = vpop.f32.mrf.mxu0  ;;  %v145_v27 = vpop.f32.mrf.mxu1 }
  0x93   :  { %242 = vst.msk [vmem:[%s480_s3 + $0x10] sm:$0xf] %vm237_vm3, %v225_v21  ;;  %v136_v28 = vadd.f32 %v395_v11, %v135_v26  ;;  %v146_v29 = vadd.f32 %v395_v11, %v145_v27 }
  0x94   :  { %vm181_vm4 = vcmp.ge.f32.partialorder %v154_v24, 0.0  ;;  %v197_v30 = vmul.f32 0.2, %v154_v24  ;;  %vm185_vm5 = vcmp.ge.f32.partialorder %v164_v25, 0.0  ;;  %v201_v31 = vmul.f32 0.2, %v164_v25 }
  0x95   :  { %vm174_vm6 = vcmp.ge.f32.partialorder %v136_v28, 0.0  ;;  %v190_v32 = vmul.f32 0.2, %v136_v28  ;;  %vm178_vm7 = vcmp.ge.f32.partialorder %v146_v29, 0.0  ;;  %v194_v33 = vmul.f32 0.2, %v146_v29 }
  0x96   :  { %v213_v34 = vsel %vm181_vm4, %v154_v24, %v197_v30  ;;  %v217_v35 = vsel %vm185_vm5, %v164_v25, %v201_v31 }
  0x97   :  { %v229_v36 = vpack.c.bf16 %v213_v34, %v213_v34  ;;  %v233_v37 = vpack.c.bf16 %v217_v35, %v217_v35  ;;  %v206_v38 = vsel %vm174_vm6, %v136_v28, %v190_v32  ;;  %v210_v39 = vsel %vm178_vm7, %v146_v29, %v194_v33 }
  0x98   :  { %v222_v40 = vpack.c.bf16 %v206_v38, %v206_v38  ;;  %v226_v41 = vpack.c.bf16 %v210_v39, %v210_v39 }
  0x99   :  { %246 = vst.msk [vmem:[%s480_s3 + $0x20] sm:$0xf] %vm237_vm3, %v229_v36  ;;  %v155_v42 = vpop.f32.mrf.mxu2  ;;  %v165_v43 = vpop.f32.mrf.mxu3 }
  0x9a   :  { %250 = vst.msk [vmem:[%s480_s3 + $0x30] sm:$0xf] %vm237_vm3, %v233_v37  ;;  %v156_v44 = vadd.f32 %v395_v11, %v155_v42  ;;  %v166_v45 = vadd.f32 %v395_v11, %v165_v43  ;;  %v138_v46 = vpop.f32.mrf.mxu0  ;;  %v148_v47 = vpop.f32.mrf.mxu1 }
  0x9b   :  { %239 = vst.msk [vmem:[%s480_s3 + $0x4] sm:$0xf] %vm237_vm3, %v222_v40  ;;  %v139_v48 = vadd.f32 %v395_v11, %v138_v46  ;;  %v149_v49 = vadd.f32 %v395_v11, %v148_v47 }
  0x9c   :  { %243 = vst.msk [vmem:[%s480_s3 + $0x14] sm:$0xf] %vm237_vm3, %v226_v41  ;;  %vm182_vm8 = vcmp.ge.f32.partialorder %v156_v44, 0.0  ;;  %v198_v50 = vmul.f32 0.2, %v156_v44  ;;  %vm186_vm9 = vcmp.ge.f32.partialorder %v166_v45, 0.0 }
  0x9d   :  { %v202_v51 = vmul.f32 0.2, %v166_v45  ;;  %vm175_vm10 = vcmp.ge.f32.partialorder %v139_v48, 0.0  ;;  %v191_v52 = vmul.f32 0.2, %v139_v48  ;;  %vm179_vm11 = vcmp.ge.f32.partialorder %v149_v49, 0.0 }
  0x9e   :  { %v214_v53 = vsel %vm182_vm8, %v156_v44, %v198_v50  ;;  %v195_v54 = vmul.f32 0.2, %v149_v49 }
  0x9f   :  { %v230_v55 = vpack.c.bf16 %v214_v53, %v214_v53  ;;  %v218_v56 = vsel %vm186_vm9, %v166_v45, %v202_v51  ;;  %v207_v57 = vsel %vm175_vm10, %v139_v48, %v191_v52 }
  0xa0   :  { %v234_v58 = vpack.c.bf16 %v218_v56, %v218_v56  ;;  %v223_v59 = vpack.c.bf16 %v207_v57, %v207_v57  ;;  %v211_v60 = vsel %vm179_vm11, %v149_v49, %v195_v54 }
  0xa1   :  { %247 = vst.msk [vmem:[%s480_s3 + $0x24] sm:$0xf] %vm237_vm3, %v230_v55  ;;  %v227_v61 = vpack.c.bf16 %v211_v60, %v211_v60  ;;  %v158_v62 = vpop.f32.mrf.mxu2  ;;  %v168_v63 = vpop.f32.mrf.mxu3 }
  0xa2   :  { %251 = vst.msk [vmem:[%s480_s3 + $0x34] sm:$0xf] %vm237_vm3, %v234_v58  ;;  %v159_v0 = vadd.f32 %v395_v11, %v158_v62  ;;  %v169_v1 = vadd.f32 %v395_v11, %v168_v63  ;;  %v140_v2 = vpop.f32.mrf.mxu0  ;;  %v150_v3 = vpop.f32.mrf.mxu1 }
  0xa3   :  { %240 = vst.msk [vmem:[%s480_s3 + $0x8] sm:$0xf] %vm237_vm3, %v223_v59  ;;  %v141_v4 = vadd.f32 %v395_v11, %v140_v2  ;;  %v151_v5 = vadd.f32 %v395_v11, %v150_v3 }
  0xa4   :  { %244 = vst.msk [vmem:[%s480_s3 + $0x18] sm:$0xf] %vm237_vm3, %v227_v61  ;;  %vm183_vm12 = vcmp.ge.f32.partialorder %v159_v0, 0.0  ;;  %v199_v6 = vmul.f32 0.2, %v159_v0  ;;  %vm187_vm13 = vcmp.ge.f32.partialorder %v169_v1, 0.0 }
  0xa5   :  { %v203_v7 = vmul.f32 0.2, %v169_v1  ;;  %vm176_vm14 = vcmp.ge.f32.partialorder %v141_v4, 0.0  ;;  %v192_v8 = vmul.f32 0.2, %v141_v4  ;;  %vm180_vm15 = vcmp.ge.f32.partialorder %v151_v5, 0.0 }
  0xa6   :  { %v215_v9 = vsel %vm183_vm12, %v159_v0, %v199_v6  ;;  %v196_v10 = vmul.f32 0.2, %v151_v5 }
  0xa7   :  { %v231_v12 = vpack.c.bf16 %v215_v9, %v215_v9  ;;  %v219_v13 = vsel %vm187_vm13, %v169_v1, %v203_v7  ;;  %v208_v14 = vsel %vm176_vm14, %v141_v4, %v192_v8 }
  0xa8   :  { %v235_v15 = vpack.c.bf16 %v219_v13, %v219_v13  ;;  %v224_v16 = vpack.c.bf16 %v208_v14, %v208_v14  ;;  %v212_v17 = vsel %vm180_vm15, %v151_v5, %v196_v10 }
  0xa9   :  { %248 = vst.msk [vmem:[%s480_s3 + $0x28] sm:$0xf] %vm237_vm3, %v231_v12  ;;  %v228_v18 = vpack.c.bf16 %v212_v17, %v212_v17  ;;  %v160_v19 = vpop.f32.mrf.mxu2  ;;  %v170_v20 = vpop.f32.mrf.mxu3 }
  0xaa   :  { %252 = vst.msk [vmem:[%s480_s3 + $0x38] sm:$0xf] %vm237_vm3, %v235_v15  ;;  %v161_v21 = vadd.f32 %v395_v11, %v160_v19  ;;  %v171_v22 = vadd.f32 %v395_v11, %v170_v20 }
  0xab   :  { %241 = vst.msk [vmem:[%s480_s3 + $0xc] sm:$0xf] %vm237_vm3, %v224_v16 }
  0xac   :  { %245 = vst.msk [vmem:[%s480_s3 + $0x1c] sm:$0xf] %vm237_vm3, %v228_v18  ;;  %vm184_vm0 = vcmp.ge.f32.partialorder %v161_v21, 0.0  ;;  %v200_v23 = vmul.f32 0.2, %v161_v21  ;;  %vm188_vm1 = vcmp.ge.f32.partialorder %v171_v22, 0.0 }
  0xad   :  { %v204_v24 = vmul.f32 0.2, %v171_v22 }
  0xae   :  { %v216_v25 = vsel %vm184_vm0, %v161_v21, %v200_v23 }
  0xaf   :  { %v232_v26 = vpack.c.bf16 %v216_v25, %v216_v25  ;;  %v220_v27 = vsel %vm188_vm1, %v171_v22, %v204_v24 }
  0xb0   :  { %v236_v28 = vpack.c.bf16 %v220_v27, %v220_v27 }
  0xb1   :  { %249 = vst.msk [vmem:[%s480_s3 + $0x2c] sm:$0xf] %vm237_vm3, %v232_v26 }
  0xb2   :  { %253 = vst.msk [vmem:[%s480_s3 + $0x3c] sm:$0xf] %vm237_vm3, %v236_v28 }

// kernel: unet_forward.7
= control target key start
LH: loop header
LB: loop body
LE: loop exit
PB: predicated region body
PF: predicated region fallthrough
CT: control target
= control target key end

     0   :  { %s115_s0 = inlined_call_operand.vmem [shape: f32[32,128], index: 0, kind: input, shape index: {}]   ;;  %s116_s1 = inlined_call_operand.vmem [shape: f32[1,128], index: 1, kind: input, shape index: {}]   ;;  %s117_s2 = inlined_call_operand.vmem [shape: f32[1,128], index: 2, kind: input, shape index: {}]   ;;  %s118_s3 = inlined_call_operand.vmem [shape: bf16[32,128], index: 3, kind: output, shape index: {}]  }
   0x1   :  { %v14_v0 = vld [vmem:[%s115_s0] sm:$0xff]  ;;  %v15_v1 = vld [vmem:[%s115_s0 + $0x8] sm:$0xff]  ;;  %v16_v4 = vld [vmem:[%s115_s0 + $0x10] sm:$0xff] }
   0x2   :  { %v69_v2 = vld [vmem:[%s116_s1] ss:$0 sm:$0xff]  ;;  %v17_v5 = vld [vmem:[%s115_s0 + $0x18] sm:$0xff] }
   0x3   :  { %v70_v3 = vld [vmem:[%s117_s2] ss:$0 sm:$0xff]  ;;  %v22_v6 = vmul.f32 %v69_v2, %v14_v0  ;;  %v23_v7 = vmul.f32 %v69_v2, %v15_v1  ;;  %v24_v8 = vmul.f32 %v69_v2, %v16_v4  ;;  %v25_v9 = vmul.f32 %v69_v2, %v17_v5 }
   0x5   :  { %v30_v10 = vadd.f32 %v70_v3, %v22_v6  ;;  %v31_v11 = vadd.f32 %v70_v3, %v23_v7  ;;  %v32_v12 = vadd.f32 %v70_v3, %v24_v8  ;;  %v33_v13 = vadd.f32 %v70_v3, %v25_v9 }
   0x7   :  { %vm34_vm0 = vcmp.ge.f32.partialorder %v30_v10, 0.0  ;;  %vm35_vm1 = vcmp.ge.f32.partialorder %v31_v11, 0.0  ;;  %v38_v14 = vmul.f32 0.2, %v30_v10  ;;  %v39_v15 = vmul.f32 0.2, %v31_v11 }
   0x8   :  { %vm36_vm2 = vcmp.ge.f32.partialorder %v32_v12, 0.0  ;;  %vm37_vm3 = vcmp.ge.f32.partialorder %v33_v13, 0.0  ;;  %v40_v16 = vmul.f32 0.2, %v32_v12  ;;  %v41_v17 = vmul.f32 0.2, %v33_v13 }
   0x9   :  { %v42_v18 = vsel %vm34_vm0, %v30_v10, %v38_v14  ;;  %v43_v19 = vsel %vm35_vm1, %v31_v11, %v39_v15 }
   0xa   :  { %v61_v20 = vpack.c.bf16 %v43_v19, %v42_v18  ;;  %v44_v21 = vsel %vm36_vm2, %v32_v12, %v40_v16  ;;  %v45_v22 = vsel %vm37_vm3, %v33_v13, %v41_v17 }
   0xb   :  { %v66_v23 = vpack.c.bf16 %v45_v22, %v44_v21 }
   0xc   :  { %62 = vst [vmem:[%s118_s3] sm:$0xff] %v61_v20  }
   0xd   :  { %68 = vst [vmem:[%s118_s3 + $0x8] sm:$0xff] %v66_v23  }

// kernel: unet_forward.6
= control target key start
LH: loop header
LB: loop body
LE: loop exit
PB: predicated region body
PF: predicated region fallthrough
CT: control target
= control target key end

     0   :  { %s1604_s1 = inlined_call_operand.vmem [shape: bf16[1024,128], index: 1, kind: input, shape index: {}]   ;;  %s1605_s0 = inlined_call_operand.vmem [shape: bf16[32,1024], index: 0, kind: input, shape index: {}]   ;;  %s1606_s2 = inlined_call_operand.vmem [shape: f32[1,128], index: 2, kind: input, shape index: {}]   ;;  %s1607_s4 = inlined_call_operand.vmem [shape: f32[1,128], index: 4, kind: output, shape index: {1}]   ;;  %s1608_s5 = inlined_call_operand.vmem [shape: f32[1,128], index: 5, kind: output, shape index: {2}]   ;;  %s1609_s3 = inlined_call_operand.vmem [shape: f32[32,128], index: 3, kind: output, shape index: {0}]  }
   0x1   :  { %v1193_v0 = vld [vmem:[%s1604_s1 + $0x38] sm:$0xff]  ;;  %v1192_v4 = vld [vmem:[%s1604_s1 + $0x30] sm:$0xff]  ;;  %v1191_v8 = vld [vmem:[%s1604_s1 + $0x28] sm:$0xff] }
   0x2   :  { %v1201_v1 = vld [vmem:[%s1604_s1 + $0x78] sm:$0xff]  ;;  %629 = vmatpush.bf16.msra.mxu0 %v1193_v0  ;;  %v1200_v5 = vld [vmem:[%s1604_s1 + $0x70] sm:$0xff]  ;;  %v1199_v9 = vld [vmem:[%s1604_s1 + $0x68] sm:$0xff] }
   0x3   :  { %v1209_v2 = vld [vmem:[%s1604_s1 + $0xb8] sm:$0xff]  ;;  %648 = vmatpush.bf16.msra.mxu1 %v1201_v1  ;;  %v1208_v6 = vld [vmem:[%s1604_s1 + $0xb0] sm:$0xff]  ;;  %v1207_v10 = vld [vmem:[%s1604_s1 + $0xa8] sm:$0xff] }
   0x4   :  { %v1217_v3 = vld [vmem:[%s1604_s1 + $0xf8] sm:$0xff]  ;;  %667 = vmatpush.bf16.msra.mxu2 %v1209_v2  ;;  %v1216_v7 = vld [vmem:[%s1604_s1 + $0xf0] sm:$0xff]  ;;  %v1215_v11 = vld [vmem:[%s1604_s1 + $0xe8] sm:$0xff] }
   0x5   :  { %686 = vmatpush.bf16.msra.mxu3 %v1217_v3  ;;  %v1190_v12 = vld [vmem:[%s1604_s1 + $0x20] sm:$0xff]  ;;  %v1189_v16 = vld [vmem:[%s1604_s1 + $0x18] sm:$0xff]  ;;  %v1188_v20 = vld [vmem:[%s1604_s1 + $0x10] sm:$0xff] }
   0x6   :  { %630 = vmatpush.bf16.msra.mxu0 %v1192_v4  ;;  %v1198_v13 = vld [vmem:[%s1604_s1 + $0x60] sm:$0xff]  ;;  %v1197_v17 = vld [vmem:[%s1604_s1 + $0x58] sm:$0xff]  ;;  %v1196_v21 = vld [vmem:[%s1604_s1 + $0x50] sm:$0xff] }
   0x7   :  { %649 = vmatpush.bf16.msra.mxu1 %v1200_v5  ;;  %v1206_v14 = vld [vmem:[%s1604_s1 + $0xa0] sm:$0xff]  ;;  %v1205_v18 = vld [vmem:[%s1604_s1 + $0x98] sm:$0xff]  ;;  %v1204_v22 = vld [vmem:[%s1604_s1 + $0x90] sm:$0xff] }
   0x8   :  { %668 = vmatpush.bf16.msra.mxu2 %v1208_v6  ;;  %v1214_v15 = vld [vmem:[%s1604_s1 + $0xe0] sm:$0xff]  ;;  %v1213_v19 = vld [vmem:[%s1604_s1 + $0xd8] sm:$0xff]  ;;  %v1212_v23 = vld [vmem:[%s1604_s1 + $0xd0] sm:$0xff] }
   0x9   :  { %687 = vmatpush.bf16.msra.mxu3 %v1216_v7  ;;  %v1187_v24 = vld [vmem:[%s1604_s1 + $0x8] sm:$0xff]  ;;  %v1186_v28 = vld [vmem:[%s1604_s1] sm:$0xff]  ;;  %v1241_v40 = vld [vmem:[%s1604_s1 + $0x1b8] sm:$0xff] }
   0xa   :  { %631 = vmatpush.bf16.msra.mxu0 %v1191_v8  ;;  %v1195_v25 = vld [vmem:[%s1604_s1 + $0x48] sm:$0xff]  ;;  %v1194_v29 = vld [vmem:[%s1604_s1 + $0x40] sm:$0xff]  ;;  %v1225_v41 = vld [vmem:[%s1604_s1 + $0x138] sm:$0xff] }
   0xb   :  { %650 = vmatpush.bf16.msra.mxu1 %v1199_v9  ;;  %v1203_v26 = vld [vmem:[%s1604_s1 + $0x88] sm:$0xff]  ;;  %v1202_v30 = vld [vmem:[%s1604_s1 + $0x80] sm:$0xff]  ;;  %v1233_v46 = vld [vmem:[%s1604_s1 + $0x178] sm:$0xff] }
   0xc   :  { %669 = vmatpush.bf16.msra.mxu2 %v1207_v10  ;;  %v1211_v27 = vld [vmem:[%s1604_s1 + $0xc8] sm:$0xff]  ;;  %v1210_v31 = vld [vmem:[%s1604_s1 + $0xc0] sm:$0xff]  ;;  %v1249_v47 = vld [vmem:[%s1604_s1 + $0x1f8] sm:$0xff] }
   0xd   :  { %688 = vmatpush.bf16.msra.mxu3 %v1215_v11  ;;  %v852_v32 = vld [vmem:[%s1605_s0] sm:$0xf]  ;;  %v1170_v34 = vld [vmem:[%s1605_s0 + $0x4] sm:$0xf]  ;;  %v860_v36 = vld [vmem:[%s1605_s0 + $0x8] sm:$0xf] }
   0xe   :  { %632 = vmatpush.bf16.msra.mxu0 %v1190_v12  ;;  %v1174_v33 = vld [vmem:[%s1605_s0 + $0x1c] sm:$0xf0]  ;;  %v854_v35 = vld [vmem:[%s1605_s0 + $0x20] sm:$0xf0]  ;;  %v1175_v37 = vld [vmem:[%s1605_s0 + $0x24] sm:$0xf0] }
   0xf   :  { %651 = vmatpush.bf16.msra.mxu1 %v1198_v13  ;;  %v1171_v38 = vld [vmem:[%s1605_s0 + $0xc] sm:$0xf]  ;;  %v853_v42 = vor.u32 %v1174_v33, %v852_v32  ;;  %v857_v43 = vor.u32 %v1170_v34, %v854_v35  ;;  %v861_v44 = vor.u32 %v1175_v37, %v860_v36  ;;  %v1240_v48 = vld [vmem:[%s1604_s1 + $0x1b0] sm:$0xff]  ;;  %v1238_v56 = vld [vmem:[%s1604_s1 + $0x1a0] sm:$0xff] }
  0x10   :  { %670 = vmatpush.bf16.msra.mxu2 %v1206_v14  ;;  %v862_v39 = vld [vmem:[%s1605_s0 + $0x28] sm:$0xf0]  ;;  %v1224_v49 = vld [vmem:[%s1604_s1 + $0x130] sm:$0xff]  ;;  %v1222_v57 = vld [vmem:[%s1604_s1 + $0x120] sm:$0xff] }
  0x11   :  { %689 = vmatpush.bf16.msra.mxu3 %v1214_v15  ;;  %v865_v45 = vor.u32 %v1171_v38, %v862_v39  ;;  %v1232_v50 = vld [vmem:[%s1604_s1 + $0x170] sm:$0xff]  ;;  %v1239_v52 = vld [vmem:[%s1604_s1 + $0x1a8] sm:$0xff]  ;;  %v1230_v58 = vld [vmem:[%s1604_s1 + $0x160] sm:$0xff] }
  0x12   :  { %633 = vmatpush.bf16.msra.mxu0 %v1189_v16  ;;  %v1248_v51 = vld [vmem:[%s1604_s1 + $0x1f0] sm:$0xff]  ;;  %v1223_v53 = vld [vmem:[%s1604_s1 + $0x128] sm:$0xff]  ;;  %v1246_v59 = vld [vmem:[%s1604_s1 + $0x1e0] sm:$0xff] }
  0x13   :  { %652 = vmatpush.bf16.msra.mxu1 %v1197_v17  ;;  %v1231_v54 = vld [vmem:[%s1604_s1 + $0x168] sm:$0xff]  ;;  %v884_v60 = vld [vmem:[%s1605_s0 + $0x40] sm:$0xf]  ;;  %v1178_v62 = vld [vmem:[%s1605_s0 + $0x44] sm:$0xf] }
  0x14   :  { %671 = vmatpush.bf16.msra.mxu2 %v1205_v18  ;;  %v1247_v55 = vld [vmem:[%s1604_s1 + $0x1e8] sm:$0xff]  ;;  %v1182_v61 = vld [vmem:[%s1605_s0 + $0x5c] sm:$0xf0]  ;;  %v886_v63 = vld [vmem:[%s1605_s0 + $0x60] sm:$0xf0] }
  0x15   :  { %690 = vmatpush.bf16.msra.mxu3 %v1213_v19  ;;  %v892_v0 = vld [vmem:[%s1605_s0 + $0x48] sm:$0xf]  ;;  %v1179_v2 = vld [vmem:[%s1605_s0 + $0x4c] sm:$0xf]  ;;  %v1237_v4 = vld [vmem:[%s1604_s1 + $0x198] sm:$0xff]  ;;  %v885_v6 = vor.u32 %v1182_v61, %v884_v60  ;;  %v889_v7 = vor.u32 %v1178_v62, %v886_v63 }
  0x16   :  { %634 = vmatpush.bf16.msra.mxu0 %v1188_v20  ;;  %v1183_v1 = vld [vmem:[%s1605_s0 + $0x64] sm:$0xf0]  ;;  %v894_v3 = vld [vmem:[%s1605_s0 + $0x68] sm:$0xf0]  ;;  %v1221_v5 = vld [vmem:[%s1604_s1 + $0x118] sm:$0xff] }
  0x17   :  { %653 = vmatpush.bf16.msra.mxu1 %v1196_v21  ;;  %v893_v8 = vor.u32 %v1183_v1, %v892_v0  ;;  %v897_v9 = vor.u32 %v1179_v2, %v894_v3  ;;  %v1229_v10 = vld [vmem:[%s1604_s1 + $0x158] sm:$0xff]  ;;  %v1236_v12 = vld [vmem:[%s1604_s1 + $0x190] sm:$0xff]  ;;  %v1235_v16 = vld [vmem:[%s1604_s1 + $0x188] sm:$0xff] }
  0x18   :  { %672 = vmatpush.bf16.msra.mxu2 %v1204_v22  ;;  %v1245_v11 = vld [vmem:[%s1604_s1 + $0x1d8] sm:$0xff]  ;;  %v1220_v13 = vld [vmem:[%s1604_s1 + $0x110] sm:$0xff]  ;;  %v1219_v17 = vld [vmem:[%s1604_s1 + $0x108] sm:$0xff] }
  0x19   :  { %691 = vmatpush.bf16.msra.mxu3 %v1212_v23  ;;  %v1228_v14 = vld [vmem:[%s1604_s1 + $0x150] sm:$0xff]  ;;  %v1227_v18 = vld [vmem:[%s1604_s1 + $0x148] sm:$0xff]  ;;  %v1234_v20 = vld [vmem:[%s1604_s1 + $0x180] sm:$0xff] }
  0x1a   :  { %635 = vmatpush.bf16.msra.mxu0 %v1187_v24  ;;  %v1244_v15 = vld [vmem:[%s1604_s1 + $0x1d0] sm:$0xff]  ;;  %v1243_v19 = vld [vmem:[%s1604_s1 + $0x1c8] sm:$0xff]  ;;  %v1218_v21 = vld [vmem:[%s1604_s1 + $0x100] sm:$0xff] }
  0x1b   :  { %654 = vmatpush.bf16.msra.mxu1 %v1195_v25  ;;  %v1226_v22 = vld [vmem:[%s1604_s1 + $0x140] sm:$0xff]  ;;  %v868_v24 = vld [vmem:[%s1605_s0 + $0x10] sm:$0xf]  ;;  %v1180_v38 = vld [vmem:[%s1605_s0 + $0x54] sm:$0xf] }
  0x1c   :  { %673 = vmatpush.bf16.msra.mxu2 %v1203_v26  ;;  %v1242_v23 = vld [vmem:[%s1604_s1 + $0x1c0] sm:$0xff]  ;;  %v1176_v25 = vld [vmem:[%s1605_s0 + $0x2c] sm:$0xf0]  ;;  %v1172_v26 = vld [vmem:[%s1605_s0 + $0x14] sm:$0xf] }
  0x1d   :  { %692 = vmatpush.bf16.msra.mxu3 %v1211_v27  ;;  %v870_v27 = vld [vmem:[%s1605_s0 + $0x30] sm:$0xf0]  ;;  %v869_v32 = vor.u32 %v1176_v25, %v868_v24  ;;  %v900_v36 = vld [vmem:[%s1605_s0 + $0x50] sm:$0xf] }
  0x1e   :  { %636 = vmatpush.bf16.msra.mxu0 %v1186_v28  ;;  %v876_v28 = vld [vmem:[%s1605_s0 + $0x18] sm:$0xf]  ;;  %v873_v33 = vor.u32 %v1172_v26, %v870_v27  ;;  %v1184_v37 = vld [vmem:[%s1605_s0 + $0x6c] sm:$0xf0]  ;;  %v902_v39 = vld [vmem:[%s1605_s0 + $0x70] sm:$0xf0] }
  0x1f   :  { %655 = vmatpush.bf16.msra.mxu1 %v1194_v29  ;;  %v1177_v29 = vld [vmem:[%s1605_s0 + $0x34] sm:$0xf0] }
  0x20   :  { %674 = vmatpush.bf16.msra.mxu2 %v1202_v30  ;;  %v1173_v30 = vld [vmem:[%s1605_s0 + $0x1c] sm:$0xf]  ;;  %v877_v34 = vor.u32 %v1177_v29, %v876_v28 }
  0x21   :  { %693 = vmatpush.bf16.msra.mxu3 %v1210_v31  ;;  %637 = vmatmul.bf16.vlgmr.msra.gmra.mxu0 %v853_v42  ;;  %v878_v31 = vld [vmem:[%s1605_s0 + $0x38] sm:$0xf0] }
  0x22   :  { %705 = vmatpush.bf16.msrb.mxu0 %v1225_v41  ;;  %656 = vmatmul.bf16.vlgmr.msra.gmra.mxu1 %v857_v43  ;;  %v881_v35 = vor.u32 %v1173_v30, %v878_v31  ;;  %v1185_v41 = vld [vmem:[%s1605_s0 + $0x74] sm:$0xf0]  ;;  %v1181_v42 = vld [vmem:[%s1605_s0 + $0x5c] sm:$0xf] }
  0x23   :  { %675 = vmatmul.bf16.vlgmr.msra.gmra.mxu2 %v861_v44  ;;  %724 = vmatpush.bf16.msrb.mxu1 %v1233_v46  ;;  %v910_v43 = vld [vmem:[%s1605_s0 + $0x78] sm:$0xf0]  ;;  %v901_v44 = vor.u32 %v1184_v37, %v900_v36 }
  0x24   :  { %743 = vmatpush.bf16.msrb.mxu2 %v1241_v40  ;;  %694 = vmatmul.bf16.vlgmr.msra.gmra.mxu3 %v865_v45  ;;  %v908_v40 = vld [vmem:[%s1605_s0 + $0x58] sm:$0xf]  ;;  %v905_v45 = vor.u32 %v1180_v38, %v902_v39 }
  0x25   :  { %762 = vmatpush.bf16.msrb.mxu3 %v1249_v47  ;;  %v909_v46 = vor.u32 %v1185_v41, %v908_v40  ;;  %v913_v47 = vor.u32 %v1181_v42, %v910_v43 }
  0x26   :  { %706 = vmatpush.bf16.msrb.mxu0 %v1224_v49 }
  0x27   :  { %725 = vmatpush.bf16.msrb.mxu1 %v1232_v50 }
  0x28   :  { %744 = vmatpush.bf16.msrb.mxu2 %v1240_v48 }
  0x29   :  { %763 = vmatpush.bf16.msrb.mxu3 %v1248_v51 }
  0x2a   :  { %707 = vmatpush.bf16.msrb.mxu0 %v1223_v53 }
  0x2b   :  { %726 = vmatpush.bf16.msrb.mxu1 %v1231_v54 }
  0x2c   :  { %745 = vmatpush.bf16.msrb.mxu2 %v1239_v52 }
  0x2d   :  { %764 = vmatpush.bf16.msrb.mxu3 %v1247_v55 }
  0x2e   :  { %708 = vmatpush.bf16.msrb.mxu0 %v1222_v57 }
  0x2f   :  { %727 = vmatpush.bf16.msrb.mxu1 %v1230_v58 }
  0x30   :  { %746 = vmatpush.bf16.msrb.mxu2 %v1238_v56  ;;  %v1251_v56 = vld [vmem:[%s1606_s2] ss:$0 sm:$0xff] }
  0x31   :  { %765 = vmatpush.bf16.msrb.mxu3 %v1246_v59  ;;  %642 = vmatmul.bf16.gmra.mxu0 %v885_v6 }
  0x32   :  { %709 = vmatpush.bf16.msrb.mxu0 %v1221_v5  ;;  %661 = vmatmul.bf16.gmra.mxu1 %v889_v7 }
  0x33   :  { %680 = vmatmul.bf16.gmra.mxu2 %v893_v8  ;;  %728 = vmatpush.bf16.msrb.mxu1 %v1229_v10 }
  0x34   :  { %747 = vmatpush.bf16.msrb.mxu2 %v1237_v4  ;;  %699 = vmatmul.bf16.gmra.mxu3 %v897_v9 }
  0x35   :  { %766 = vmatpush.bf16.msrb.mxu3 %v1245_v11 }
  0x36   :  { %710 = vmatpush.bf16.msrb.mxu0 %v1220_v13 }
  0x37   :  { %729 = vmatpush.bf16.msrb.mxu1 %v1228_v14 }
  0x38   :  { %748 = vmatpush.bf16.msrb.mxu2 %v1236_v12  ;;  %v1252_v12 = vmov 0.0  }
  0x39   :  { %767 = vmatpush.bf16.msrb.mxu3 %v1244_v15  ;;  %789 = vst [vmem:[%s1607_s4] sm:$0x1] %v1252_v12 }
  0x3a   :  { %711 = vmatpush.bf16.msrb.mxu0 %v1219_v17  ;;  %790 = vst [vmem:[%s1608_s5] sm:$0x1] %v1252_v12 }
  0x3b   :  { %730 = vmatpush.bf16.msrb.mxu1 %v1227_v18 }
  0x3c   :  { %749 = vmatpush.bf16.msrb.mxu2 %v1235_v16 }
  0x3d   :  { %768 = vmatpush.bf16.msrb.mxu3 %v1243_v19 }
  0x3e   :  { %712 = vmatpush.bf16.msrb.mxu0 %v1218_v21 }
  0x3f   :  { %731 = vmatpush.bf16.msrb.mxu1 %v1226_v22 }
  0x40   :  { %750 = vmatpush.bf16.msrb.mxu2 %v1234_v20 }
  0x41   :  { %769 = vmatpush.bf16.msrb.mxu3 %v1242_v23  ;;  %713 = vmatmul.bf16.vlgmr.msrb.gmra.mxu0 %v869_v32 }
  0x42   :  { %732 = vmatmul.bf16.vlgmr.msrb.gmra.mxu1 %v873_v33 }
  0x43   :  { %751 = vmatmul.bf16.vlgmr.msrb.gmra.mxu2 %v877_v34 }
  0x44   :  { %770 = vmatmul.bf16.vlgmr.msrb.gmra.mxu3 %v881_v35 }
  0x51   :  { %718 = vmatmul.bf16.gmra.mxu0 %v901_v44 }
  0x52   :  { %737 = vmatmul.bf16.gmra.mxu1 %v905_v45 }
  0x53   :  { %756 = vmatmul.bf16.gmra.mxu2 %v909_v46 }
  0x54   :  { %775 = vmatmul.bf16.gmra.mxu3 %v913_v47 }
  0x9e   :  { %v638_v48 = vpop.f32.mrf.mxu0 }
  0x9f   :  { %v657_v49 = vpop.f32.mrf.mxu1  ;;  %v639_v59 = vadd.f32 %v1251_v56, %v638_v48 }
  0xa1   :  { %v658_v62 = vadd.f32 %v657_v49, %v639_v59 }
  0xa6   :  { %v676_v50 = vpop.f32.mrf.mxu2  ;;  %v640_v52 = vpop.f32.mrf.mxu0 }
  0xa7   :  { %v695_v51 = vpop.f32.mrf.mxu3  ;;  %v659_v53 = vpop.f32.mrf.mxu1  ;;  %v677_v1 = vadd.f32 %v676_v50, %v658_v62  ;;  %v641_v2 = vadd.f32 %v1251_v56, %v640_v52 }
  0xa9   :  { %v696_v5 = vadd.f32 %v695_v51, %v677_v1  ;;  %v660_v8 = vadd.f32 %v659_v53, %v641_v2 }
  0xae   :  { %v678_v54 = vpop.f32.mrf.mxu2  ;;  %v643_v57 = vpop.f32.mrf.mxu0 }
  0xaf   :  { %v697_v55 = vpop.f32.mrf.mxu3  ;;  %v662_v58 = vpop.f32.mrf.mxu1  ;;  %v679_v10 = vadd.f32 %v678_v54, %v660_v8  ;;  %v644_v11 = vadd.f32 %v1251_v56, %v643_v57  ;;  %v822_v8 = vld [vmem:[%s1608_s5] sm:$0x1] }
  0xb1   :  { %v698_v15 = vadd.f32 %v697_v55, %v679_v10  ;;  %v663_v16 = vadd.f32 %v662_v58, %v644_v11 }
  0xb6   :  { %v681_v60 = vpop.f32.mrf.mxu2  ;;  %v645_v63 = vpop.f32.mrf.mxu0 }
  0xb7   :  { %v700_v61 = vpop.f32.mrf.mxu3  ;;  %v664_v0 = vpop.f32.mrf.mxu1  ;;  %v682_v23 = vadd.f32 %v681_v60, %v663_v16  ;;  %v646_v24 = vadd.f32 %v1251_v56, %v645_v63 }
  0xb9   :  { %v701_v27 = vadd.f32 %v700_v61, %v682_v23  ;;  %v665_v31 = vadd.f32 %v664_v0, %v646_v24 }
  0xbe   :  { %v683_v3 = vpop.f32.mrf.mxu2  ;;  %v714_v6 = vpop.f32.mrf.mxu0 }
  0xbf   :  { %v702_v4 = vpop.f32.mrf.mxu3  ;;  %v733_v7 = vpop.f32.mrf.mxu1  ;;  %v715_v9 = vadd.f32 %v714_v6, %v696_v5  ;;  %v684_v35 = vadd.f32 %v683_v3, %v665_v31  ;;  %v810_v5 = vld [vmem:[%s1607_s4] sm:$0x1] }
  0xc1   :  { %v734_v13 = vadd.f32 %v733_v7, %v715_v9  ;;  %v703_v38 = vadd.f32 %v702_v4, %v684_v35 }
  0xc6   :  { %v752_v14 = vpop.f32.mrf.mxu2  ;;  %v716_v19 = vpop.f32.mrf.mxu0 }
  0xc7   :  { %v753_v17 = vadd.f32 %v752_v14, %v734_v13  ;;  %v771_v18 = vpop.f32.mrf.mxu3  ;;  %v735_v20 = vpop.f32.mrf.mxu1  ;;  %v717_v22 = vadd.f32 %v716_v19, %v698_v15 }
  0xc9   :  { %v772_v21 = vadd.f32 %v771_v18, %v753_v17  ;;  %v736_v25 = vadd.f32 %v735_v20, %v717_v22 }
  0xcb   :  { %781 = vst [vmem:[%s1609_s3] sm:$0xff] %v772_v21  ;;  %v823_v48 = vmul.f32 %v772_v21, %v772_v21 }
  0xce   :  { %v754_v26 = vpop.f32.mrf.mxu2  ;;  %v719_v30 = vpop.f32.mrf.mxu0 }
  0xcf   :  { %v755_v28 = vadd.f32 %v754_v26, %v736_v25  ;;  %v773_v29 = vpop.f32.mrf.mxu3  ;;  %v720_v33 = vadd.f32 %v719_v30, %v701_v27  ;;  %v738_v34 = vpop.f32.mrf.mxu1 }
  0xd1   :  { %v774_v32 = vadd.f32 %v773_v29, %v755_v28  ;;  %v739_v36 = vadd.f32 %v738_v34, %v720_v33 }
  0xd3   :  { %782 = vst [vmem:[%s1609_s3 + $0x8] sm:$0xff] %v774_v32  ;;  %v824_v45 = vmul.f32 %v774_v32, %v774_v32  ;;  %v811_v49 = vadd.f32 %v774_v32, %v772_v21 }
  0xd5   :  { %v827_v53 = vadd.f32 %v824_v45, %v823_v48 }
  0xd6   :  { %v757_v37 = vpop.f32.mrf.mxu2  ;;  %v721_v41 = vpop.f32.mrf.mxu0 }
  0xd7   :  { %v758_v39 = vadd.f32 %v757_v37, %v739_v36  ;;  %v776_v40 = vpop.f32.mrf.mxu3  ;;  %v722_v43 = vadd.f32 %v721_v41, %v703_v38  ;;  %v740_v44 = vpop.f32.mrf.mxu1 }
  0xd9   :  { %v777_v42 = vadd.f32 %v776_v40, %v758_v39  ;;  %v741_v46 = vadd.f32 %v740_v44, %v722_v43 }
  0xdb   :  { %783 = vst [vmem:[%s1609_s3 + $0x10] sm:$0xff] %v777_v42  ;;  %v825_v50 = vmul.f32 %v777_v42, %v777_v42  ;;  %v812_v54 = vadd.f32 %v811_v49, %v777_v42 }
  0xdd   :  { %v828_v56 = vadd.f32 %v827_v53, %v825_v50 }
  0xde   :  { %v759_v47 = vpop.f32.mrf.mxu2 }
  0xdf   :  { %v760_v51 = vadd.f32 %v759_v47, %v741_v46  ;;  %v778_v52 = vpop.f32.mrf.mxu3 }
  0xe1   :  { %v779_v55 = vadd.f32 %v778_v52, %v760_v51 }
  0xe3   :  { %784 = vst [vmem:[%s1609_s3 + $0x18] sm:$0xff] %v779_v55  ;;  %v813_v57 = vadd.f32 %v812_v54, %v779_v55  ;;  %v826_v58 = vmul.f32 %v779_v55, %v779_v55 }
  0xe5   :  { %v814_v59 = vrot.slane %v813_v57, 4  ;;  %v829_v60 = vadd.f32 %v828_v56, %v826_v58 }
  0xe7   :  { %v815_v61 = vadd.f32 %v814_v59, %v813_v57  ;;  %v830_v62 = vrot.slane %v829_v60, 4 }
  0xe9   :  { %v816_v63 = vrot.slane %v815_v61, 2  ;;  %v831_v0 = vadd.f32 %v830_v62, %v829_v60 }
  0xeb   :  { %v817_v1 = vadd.f32 %v816_v63, %v815_v61  ;;  %v832_v2 = vrot.slane %v831_v0, 2 }
  0xed   :  { %v818_v3 = vrot.slane %v817_v1, 1  ;;  %v833_v4 = vadd.f32 %v832_v2, %v831_v0 }
  0xef   :  { %v819_v6 = vadd.f32 %v818_v3, %v817_v1  ;;  %v834_v7 = vrot.slane %v833_v4, 1 }
  0xf1   :  { %v820_v9 = vadd.f32 %v819_v6, %v810_v5  ;;  %v835_v10 = vadd.f32 %v834_v7, %v833_v4 }
  0xf3   :  { %821 = vst [vmem:[%s1607_s4] sm:$0x1] %v820_v9  ;;  %v836_v11 = vadd.f32 %v835_v10, %v822_v8 }
  0xf5   :  { %837 = vst [vmem:[%s1608_s5] sm:$0x1] %v836_v11 }

// kernel: unet_forward.8
= control target key start
LH: loop header
LB: loop body
LE: loop exit
PB: predicated region body
PF: predicated region fallthrough
CT: control target
= control target key end

     0   :  { %s1040_s12 = smov 0   ;;  %s1042_s13 = smov 0   ;;  %s1152_s0 = inlined_call_operand.vmem [shape: bf16[4,32,512], index: 0, kind: input, shape index: {}]   ;;  %s1153_s1 = inlined_call_operand.vmem [shape: bf16[4,512,64], index: 1, kind: input, shape index: {}]   ;;  %s1154_s2 = inlined_call_operand.vmem [shape: f32[4,1,64], index: 2, kind: input, shape index: {}]   ;;  %s1155_s3 = inlined_call_operand.vmem [shape: bf16[4,32,64], index: 3, kind: output, shape index: {}]  }
   0x1   :  { %s1044_s14 = smov 0  }
   0x2 LB: > { %s25_s15 = sadd.s32 1, %s1014_s13  ;;  %p759_p0 = scmp.ge.s32.totalorder %s1018_s14, 1  ;;  %s1018_s14 = sphi %s1044_s14, %s13_s14   ;;  %s1014_s13 = sphi %s1042_s13, %s1157_s13   ;;  %s1010_s12 = sphi %s1040_s12, %s1156_s12  }
   0x3   : > { %p27_p1 = scmp.ge.s32.totalorder %s25_s15, 4  ;;  %p177_p2 = scmp.lt.s32.totalorder %s1018_s14, 5 }
   0x5   : > { %s1159_s15 = smov (%p27_p1, %s25_s15), 0  ;;  %p178_p3 = pnand %p759_p0, %p177_p2 }
   0x6   : > { %p219_p4 = scmp.lt.s32.totalorder (!%p178_p3), %s1010_s12, 3 }
   0x7   : > { %181 = sbr.rel (%p178_p3) target bundleno = 214 (0xd6), region = 32 }
   0xc   : > { %s1161_s12 = smov (!%p219_p4, %s1010_s12), 3  ;;  %vm639_vm0 = vcmask 519168  }
   0xd   : > { %s929_s16 = sshll.u32 %s1161_s12, 8  ;;  %s236_s22 = scalar_lea.vmem %s1154_s2, %s1161_s12 }
   0xe   : > { %s1064_s19 = scalar_lea.vmem %s1153_s1, %s929_s16  ;;  %s928_s23 = sshll.u32 %s1161_s12, 6  ;;  %v995_v56 = vld [vmem:[%s236_s22] ss:$0 sm:$0xff] }
   0xf   : > { %v946_v0 = vld [vmem:[%s1064_s19 + $0x38] sm:$0xff]  ;;  %v945_v4 = vld [vmem:[%s1064_s19 + $0x30] sm:$0xff]  ;;  %v944_v8 = vld [vmem:[%s1064_s19 + $0x28] sm:$0xff]  ;;  %s1100_s26 = scalar_lea.vmem %s1152_s0, %s928_s23  ;;  %s930_s29 = sshll.u32 %s1161_s12, 4 }
  0x10   : > { %v954_v1 = vld [vmem:[%s1064_s19 + $0x78] sm:$0xff]  ;;  %555 = vmatpush.bf16.msra.mxu0 %v946_v0  ;;  %v953_v5 = vld [vmem:[%s1064_s19 + $0x70] sm:$0xff]  ;;  %v952_v9 = vld [vmem:[%s1064_s19 + $0x68] sm:$0xff]  ;;  %s1133_s5 = scalar_lea.vmem %s1155_s3, %s930_s29 }
  0x11   : > { %v962_v2 = vld [vmem:[%s1064_s19 + $0xb8] sm:$0xff]  ;;  %574 = vmatpush.bf16.msra.mxu1 %v954_v1  ;;  %v961_v6 = vld [vmem:[%s1064_s19 + $0xb0] sm:$0xff]  ;;  %v960_v10 = vld [vmem:[%s1064_s19 + $0xa8] sm:$0xff] }
  0x12   : > { %v970_v3 = vld [vmem:[%s1064_s19 + $0xf8] sm:$0xff]  ;;  %593 = vmatpush.bf16.msra.mxu2 %v962_v2  ;;  %v969_v7 = vld [vmem:[%s1064_s19 + $0xf0] sm:$0xff]  ;;  %v968_v11 = vld [vmem:[%s1064_s19 + $0xe8] sm:$0xff] }
  0x13   : > { %612 = vmatpush.bf16.msra.mxu3 %v970_v3  ;;  %v943_v12 = vld [vmem:[%s1064_s19 + $0x20] sm:$0xff]  ;;  %v942_v16 = vld [vmem:[%s1064_s19 + $0x18] sm:$0xff]  ;;  %v941_v20 = vld [vmem:[%s1064_s19 + $0x10] sm:$0xff] }
  0x14   : > { %556 = vmatpush.bf16.msra.mxu0 %v945_v4  ;;  %v951_v13 = vld [vmem:[%s1064_s19 + $0x60] sm:$0xff]  ;;  %v950_v17 = vld [vmem:[%s1064_s19 + $0x58] sm:$0xff]  ;;  %v949_v21 = vld [vmem:[%s1064_s19 + $0x50] sm:$0xff] }
  0x15   : > { %575 = vmatpush.bf16.msra.mxu1 %v953_v5  ;;  %v959_v14 = vld [vmem:[%s1064_s19 + $0xa0] sm:$0xff]  ;;  %v958_v18 = vld [vmem:[%s1064_s19 + $0x98] sm:$0xff]  ;;  %v957_v22 = vld [vmem:[%s1064_s19 + $0x90] sm:$0xff] }
  0x16   : > { %594 = vmatpush.bf16.msra.mxu2 %v961_v6  ;;  %v967_v15 = vld [vmem:[%s1064_s19 + $0xe0] sm:$0xff]  ;;  %v966_v19 = vld [vmem:[%s1064_s19 + $0xd8] sm:$0xff]  ;;  %v965_v23 = vld [vmem:[%s1064_s19 + $0xd0] sm:$0xff] }
  0x17   : > { %613 = vmatpush.bf16.msra.mxu3 %v969_v7  ;;  %v940_v24 = vld [vmem:[%s1064_s19 + $0x8] sm:$0xff]  ;;  %v939_v28 = vld [vmem:[%s1064_s19] sm:$0xff]  ;;  %v933_v33 = vld [vmem:[%s1100_s26 + $0xc] sm:$0xf0] }
  0x18   : > { %557 = vmatpush.bf16.msra.mxu0 %v944_v8  ;;  %v948_v25 = vld [vmem:[%s1064_s19 + $0x48] sm:$0xff]  ;;  %v947_v29 = vld [vmem:[%s1064_s19 + $0x40] sm:$0xff]  ;;  %v770_v35 = vld [vmem:[%s1100_s26 + $0x10] sm:$0xf0] }
  0x19   : > { %576 = vmatpush.bf16.msra.mxu1 %v952_v9  ;;  %v956_v26 = vld [vmem:[%s1064_s19 + $0x88] sm:$0xff]  ;;  %v955_v30 = vld [vmem:[%s1064_s19 + $0x80] sm:$0xff]  ;;  %v934_v37 = vld [vmem:[%s1100_s26 + $0x14] sm:$0xf0] }
  0x1a   : > { %595 = vmatpush.bf16.msra.mxu2 %v960_v10  ;;  %v964_v27 = vld [vmem:[%s1064_s19 + $0xc8] sm:$0xff]  ;;  %v963_v31 = vld [vmem:[%s1064_s19 + $0xc0] sm:$0xff]  ;;  %v778_v39 = vld [vmem:[%s1100_s26 + $0x18] sm:$0xf0] }
  0x1b   : > { %614 = vmatpush.bf16.msra.mxu3 %v968_v11  ;;  %v768_v32 = vld [vmem:[%s1100_s26] sm:$0xf]  ;;  %v931_v34 = vld [vmem:[%s1100_s26 + $0x4] sm:$0xf]  ;;  %v776_v36 = vld [vmem:[%s1100_s26 + $0x8] sm:$0xf] }
  0x1c   : > { %558 = vmatpush.bf16.msra.mxu0 %v943_v12  ;;  %v932_v38 = vld [vmem:[%s1100_s26 + $0xc] sm:$0xf]  ;;  %v769_v40 = vor.u32 %v933_v33, %v768_v32  ;;  %v773_v41 = vor.u32 %v931_v34, %v770_v35  ;;  %v777_v42 = vor.u32 %v934_v37, %v776_v36  ;;  %v784_v44 = vld [vmem:[%s1100_s26 + $0x20] sm:$0xf]  ;;  %v937_v45 = vld [vmem:[%s1100_s26 + $0x2c] sm:$0xf0] }
  0x1d   : > { %577 = vmatpush.bf16.msra.mxu1 %v951_v13  ;;  %v781_v43 = vor.u32 %v932_v38, %v778_v39  ;;  %v935_v46 = vld [vmem:[%s1100_s26 + $0x24] sm:$0xf]  ;;  %v786_v47 = vld [vmem:[%s1100_s26 + $0x30] sm:$0xf0]  ;;  %v792_v48 = vld [vmem:[%s1100_s26 + $0x28] sm:$0xf]  ;;  %v785_v52 = vor.u32 %v937_v45, %v784_v44 }
  0x1e   : > { %596 = vmatpush.bf16.msra.mxu2 %v959_v14  ;;  %v938_v49 = vld [vmem:[%s1100_s26 + $0x34] sm:$0xf0]  ;;  %v936_v50 = vld [vmem:[%s1100_s26 + $0x2c] sm:$0xf]  ;;  %v794_v51 = vld [vmem:[%s1100_s26 + $0x38] sm:$0xf0]  ;;  %v789_v53 = vor.u32 %v935_v46, %v786_v47 }
  0x1f   : > { %615 = vmatpush.bf16.msra.mxu3 %v967_v15  ;;  %v793_v54 = vor.u32 %v938_v49, %v792_v48  ;;  %v797_v55 = vor.u32 %v936_v50, %v794_v51 }
  0x20   : > { %559 = vmatpush.bf16.msra.mxu0 %v942_v16 }
  0x21   : > { %578 = vmatpush.bf16.msra.mxu1 %v950_v17 }
  0x22   : > { %597 = vmatpush.bf16.msra.mxu2 %v958_v18 }
  0x23   : > { %616 = vmatpush.bf16.msra.mxu3 %v966_v19 }
  0x24   : > { %560 = vmatpush.bf16.msra.mxu0 %v941_v20 }
  0x25   : > { %579 = vmatpush.bf16.msra.mxu1 %v949_v21 }
  0x26   : > { %598 = vmatpush.bf16.msra.mxu2 %v957_v22 }
  0x27   : > { %617 = vmatpush.bf16.msra.mxu3 %v965_v23 }
  0x28   : > { %561 = vmatpush.bf16.msra.mxu0 %v940_v24 }
  0x29   : > { %580 = vmatpush.bf16.msra.mxu1 %v948_v25 }
  0x2a   : > { %599 = vmatpush.bf16.msra.mxu2 %v956_v26 }
  0x2b   : > { %618 = vmatpush.bf16.msra.mxu3 %v964_v27 }
  0x2c   : > { %562 = vmatpush.bf16.msra.mxu0 %v939_v28 }
  0x2d   : > { %581 = vmatpush.bf16.msra.mxu1 %v947_v29 }
  0x2e   : > { %600 = vmatpush.bf16.msra.mxu2 %v955_v30 }
  0x2f   : > { %619 = vmatpush.bf16.msra.mxu3 %v963_v31  ;;  %563 = vmatmul.bf16.vlgmr.msra.gmra.mxu0 %v769_v40 }
  0x30   : > { %582 = vmatmul.bf16.vlgmr.msra.gmra.mxu1 %v773_v41 }
  0x31   : > { %601 = vmatmul.bf16.vlgmr.msra.gmra.mxu2 %v777_v42 }
  0x32   : > { %620 = vmatmul.bf16.vlgmr.msra.gmra.mxu3 %v781_v43 }
  0x3f   : > { %568 = vmatmul.bf16.gmra.mxu0 %v785_v52 }
  0x40   : > { %587 = vmatmul.bf16.gmra.mxu1 %v789_v53 }
  0x41   : > { %606 = vmatmul.bf16.gmra.mxu2 %v793_v54 }
  0x42   : > { %625 = vmatmul.bf16.gmra.mxu3 %v797_v55 }
  0xac   : > { %v564_v57 = vpop.f32.mrf.mxu0 }
  0xad   : > { %v583_v58 = vpop.f32.mrf.mxu1  ;;  %v565_v59 = vadd.f32 %v995_v56, %v564_v57 }
  0xaf   : > { %v584_v60 = vadd.f32 %v583_v58, %v565_v59 }
  0xb4   : > { %v602_v61 = vpop.f32.mrf.mxu2  ;;  %v566_v0 = vpop.f32.mrf.mxu0 }
  0xb5   : > { %v621_v62 = vpop.f32.mrf.mxu3  ;;  %v603_v63 = vadd.f32 %v602_v61, %v584_v60  ;;  %v585_v1 = vpop.f32.mrf.mxu1  ;;  %v567_v3 = vadd.f32 %v995_v56, %v566_v0 }
  0xb7   : > { %v622_v2 = vadd.f32 %v621_v62, %v603_v63  ;;  %v586_v6 = vadd.f32 %v585_v1, %v567_v3 }
  0xb9   : > { %v631_v4 = vmax.f32 %v622_v2, 0.0 }
  0xbb   : > { %v635_v5 = vpack.c.bf16 %v631_v4, %v631_v4 }
  0xbc   : > { %v604_v7 = vpop.f32.mrf.mxu2  ;;  %v569_v10 = vpop.f32.mrf.mxu0 }
  0xbd   : > { %v623_v8 = vpop.f32.mrf.mxu3  ;;  %640 = vst.msk [vmem:[%s1133_s5] sm:$0xf] %vm639_vm0, %v635_v5  ;;  %v605_v9 = vadd.f32 %v604_v7, %v586_v6  ;;  %v570_v11 = vadd.f32 %v995_v56, %v569_v10  ;;  %v588_v13 = vpop.f32.mrf.mxu1 }
  0xbf   : > { %v624_v12 = vadd.f32 %v623_v8, %v605_v9  ;;  %v589_v15 = vadd.f32 %v588_v13, %v570_v11 }
  0xc1   : > { %v632_v14 = vmax.f32 %v624_v12, 0.0 }
  0xc3   : > { %v636_v16 = vpack.c.bf16 %v632_v14, %v632_v14 }
  0xc4   : > { %v607_v17 = vpop.f32.mrf.mxu2  ;;  %v571_v20 = vpop.f32.mrf.mxu0 }
  0xc5   : > { %v626_v18 = vpop.f32.mrf.mxu3  ;;  %641 = vst.msk [vmem:[%s1133_s5 + $0x4] sm:$0xf] %vm639_vm0, %v636_v16  ;;  %v608_v19 = vadd.f32 %v607_v17, %v589_v15  ;;  %v572_v22 = vadd.f32 %v995_v56, %v571_v20  ;;  %v590_v24 = vpop.f32.mrf.mxu1 }
  0xc7   : > { %v627_v21 = vadd.f32 %v626_v18, %v608_v19  ;;  %v591_v26 = vadd.f32 %v590_v24, %v572_v22 }
  0xc9   : > { %v633_v23 = vmax.f32 %v627_v21, 0.0 }
  0xcb   : > { %v637_v25 = vpack.c.bf16 %v633_v23, %v633_v23 }
  0xcc   : > { %v609_v27 = vpop.f32.mrf.mxu2 }
  0xcd   : > { %642 = vst.msk [vmem:[%s1133_s5 + $0x8] sm:$0xf] %vm639_vm0, %v637_v25  ;;  %v610_v28 = vadd.f32 %v609_v27, %v591_v26  ;;  %v628_v29 = vpop.f32.mrf.mxu3 }
  0xcf   : > { %v629_v30 = vadd.f32 %v628_v29, %v610_v28 }
  0xd1   : > { %v634_v31 = vmax.f32 %v629_v30, 0.0 }
  0xd3   : > { %v638_v32 = vpack.c.bf16 %v634_v31, %v634_v31 }
  0xd5   : > { %643 = vst.msk [vmem:[%s1133_s5 + $0xc] sm:$0xf] %vm639_vm0, %v638_v32 }
  0xd6 PF: > { %s13_s14 = sadd.s32 1, %s1018_s14   ;;  %s1156_s12 = smov %s1014_s13 }
  0xd7   : > { %p10_p5 = scmp.ge.s32.totalorder %s13_s14, 6   ;;  %s1157_s13 = smov %s1159_s15 }
  0xd9   :  { %12 = sbr.rel (!%p10_p5) target bundleno = 2 (0x2), region = 68 }

// kernel: unet_forward.9
= control target key start
LH: loop header
LB: loop body
LE: loop exit
PB: predicated region body
PF: predicated region fallthrough
CT: control target
= control target key end

     0   :  { %s1010_s12 = smov 0   ;;  %s1012_s13 = smov 0   ;;  %s1167_s0 = inlined_call_operand.vmem [shape: bf16[4,128,256], index: 0, kind: input, shape index: {}]   ;;  %s1168_s1 = inlined_call_operand.vmem [shape: bf16[4,256,64], index: 1, kind: input, shape index: {}]   ;;  %s1169_s2 = inlined_call_operand.vmem [shape: f32[4,1,64], index: 2, kind: input, shape index: {}]   ;;  %s1170_s3 = inlined_call_operand.vmem [shape: f32[4,128,64], index: 3, kind: output, shape index: {}]  }
   0x1   :  { %s1014_s14 = smov 0  }
   0x2 LB: > { %s25_s15 = sadd.s32 1, %s984_s13  ;;  %p721_p0 = scmp.ge.s32.totalorder %s988_s14, 1  ;;  %s988_s14 = sphi %s1014_s14, %s13_s14   ;;  %s984_s13 = sphi %s1012_s13, %s1172_s13   ;;  %s980_s12 = sphi %s1010_s12, %s1171_s12  }
   0x3   : > { %p27_p1 = scmp.ge.s32.totalorder %s25_s15, 4  ;;  %p177_p2 = scmp.lt.s32.totalorder %s988_s14, 5 }
   0x5   : > { %s1174_s15 = smov (%p27_p1, %s25_s15), 0  ;;  %p178_p3 = pnand %p721_p0, %p177_p2 }
   0x6   : > { %p219_p4 = scmp.lt.s32.totalorder (!%p178_p3), %s980_s12, 3 }
   0x7   : > { %181 = sbr.rel (%p178_p3) target bundleno = 247 (0xf7), region = 32 }
   0xc   : > { %s1176_s12 = smov (!%p219_p4, %s980_s12), 3  ;;  %vm589_vm0 = vcmask 523264  }
   0xd   : > { %s1031_s16 = sshll.u32 %s1176_s12, 7  ;;  %s236_s19 = scalar_lea.vmem %s1169_s2, %s1176_s12 }
   0xe   : > { %s1041_s22 = scalar_lea.vmem %s1168_s1, %s1031_s16  ;;  %s1060_s25 = scalar_lea.vmem %s1167_s0, %s1031_s16 }
   0xf   : > { %v884_v0 = vld [vmem:[%s1041_s22 + $0x38] sm:$0xff]  ;;  %v883_v2 = vld [vmem:[%s1041_s22 + $0x30] sm:$0xff]  ;;  %v882_v4 = vld [vmem:[%s1041_s22 + $0x28] sm:$0xff]  ;;  %s1110_s30 = scalar_lea.vmem %s1170_s3, %s1031_s16 }
  0x10   : > { %v892_v1 = vld [vmem:[%s1041_s22 + $0x78] sm:$0xff]  ;;  %475 = vmatpush.bf16.msra.mxu0 %v884_v0  ;;  %893 = vmatpush.bf16.msra.mxu2 %v884_v0  ;;  %v891_v3 = vld [vmem:[%s1041_s22 + $0x70] sm:$0xff]  ;;  %v890_v5 = vld [vmem:[%s1041_s22 + $0x68] sm:$0xff] }
  0x11   : > { %524 = vmatpush.bf16.msra.mxu1 %v892_v1  ;;  %901 = vmatpush.bf16.msra.mxu3 %v892_v1  ;;  %v881_v6 = vld [vmem:[%s1041_s22 + $0x20] sm:$0xff]  ;;  %v880_v8 = vld [vmem:[%s1041_s22 + $0x18] sm:$0xff]  ;;  %v879_v10 = vld [vmem:[%s1041_s22 + $0x10] sm:$0xff] }
  0x12   : > { %v889_v7 = vld [vmem:[%s1041_s22 + $0x60] sm:$0xff]  ;;  %v888_v9 = vld [vmem:[%s1041_s22 + $0x58] sm:$0xff]  ;;  %v887_v11 = vld [vmem:[%s1041_s22 + $0x50] sm:$0xff] }
  0x13   : > { %v878_v12 = vld [vmem:[%s1041_s22 + $0x8] sm:$0xff]  ;;  %v877_v14 = vld [vmem:[%s1041_s22] sm:$0xff]  ;;  %v738_v28 = vld [vmem:[%s1060_s25 + $0x10] sm:$0xf] }
  0x14   : > { %476 = vmatpush.bf16.msra.mxu0 %v883_v2  ;;  %894 = vmatpush.bf16.msra.mxu2 %v883_v2  ;;  %v886_v13 = vld [vmem:[%s1041_s22 + $0x48] sm:$0xff]  ;;  %v885_v15 = vld [vmem:[%s1041_s22 + $0x40] sm:$0xff]  ;;  %v864_v29 = vld [vmem:[%s1060_s25 + $0x14] sm:$0xf0] }
  0x15   : > { %525 = vmatpush.bf16.msra.mxu1 %v891_v3  ;;  %902 = vmatpush.bf16.msra.mxu3 %v891_v3  ;;  %v730_v16 = vld [vmem:[%s1060_s25] sm:$0xf]  ;;  %v862_v17 = vld [vmem:[%s1060_s25 + $0x4] sm:$0xf0]  ;;  %v861_v20 = vld [vmem:[%s1060_s25 + $0x4] sm:$0xf]  ;;  %v739_v36 = vor.u32 %v864_v29, %v738_v28 }
  0x16   : > { %v762_v18 = vld [vmem:[%s1060_s25 + $0x40] sm:$0xf]  ;;  %v870_v19 = vld [vmem:[%s1060_s25 + $0x44] sm:$0xf0]  ;;  %v732_v21 = vld [vmem:[%s1060_s25 + $0x8] sm:$0xf0]  ;;  %v731_v24 = vor.u32 %v862_v17, %v730_v16 }
  0x17   : > { %v869_v22 = vld [vmem:[%s1060_s25 + $0x44] sm:$0xf]  ;;  %v764_v23 = vld [vmem:[%s1060_s25 + $0x48] sm:$0xf0]  ;;  %v763_v25 = vor.u32 %v870_v19, %v762_v18  ;;  %v735_v26 = vor.u32 %v861_v20, %v732_v21  ;;  %v770_v30 = vld [vmem:[%s1060_s25 + $0x50] sm:$0xf] }
  0x18   : > { %477 = vmatpush.bf16.msra.mxu0 %v882_v4  ;;  %895 = vmatpush.bf16.msra.mxu2 %v882_v4  ;;  %v767_v27 = vor.u32 %v869_v22, %v764_v23  ;;  %v872_v31 = vld [vmem:[%s1060_s25 + $0x54] sm:$0xf0]  ;;  %v863_v32 = vld [vmem:[%s1060_s25 + $0x14] sm:$0xf]  ;;  %v740_v33 = vld [vmem:[%s1060_s25 + $0x18] sm:$0xf0] }
  0x19   : > { %526 = vmatpush.bf16.msra.mxu1 %v890_v5  ;;  %903 = vmatpush.bf16.msra.mxu3 %v890_v5  ;;  %v871_v34 = vld [vmem:[%s1060_s25 + $0x54] sm:$0xf]  ;;  %v772_v35 = vld [vmem:[%s1060_s25 + $0x58] sm:$0xf0]  ;;  %v771_v37 = vor.u32 %v872_v31, %v770_v30  ;;  %v743_v38 = vor.u32 %v863_v32, %v740_v33  ;;  %v746_v40 = vld [vmem:[%s1060_s25 + $0x20] sm:$0xf] }
  0x1a   : > { %v775_v39 = vor.u32 %v871_v34, %v772_v35  ;;  %v866_v41 = vld [vmem:[%s1060_s25 + $0x24] sm:$0xf0]  ;;  %v778_v42 = vld [vmem:[%s1060_s25 + $0x60] sm:$0xf]  ;;  %v865_v44 = vld [vmem:[%s1060_s25 + $0x24] sm:$0xf] }
  0x1b   : > { %v874_v43 = vld [vmem:[%s1060_s25 + $0x64] sm:$0xf0]  ;;  %v748_v45 = vld [vmem:[%s1060_s25 + $0x28] sm:$0xf0]  ;;  %v873_v46 = vld [vmem:[%s1060_s25 + $0x64] sm:$0xf]  ;;  %v747_v48 = vor.u32 %v866_v41, %v746_v40 }
  0x1c   : > { %478 = vmatpush.bf16.msra.mxu0 %v881_v6  ;;  %896 = vmatpush.bf16.msra.mxu2 %v881_v6  ;;  %v780_v47 = vld [vmem:[%s1060_s25 + $0x68] sm:$0xf0]  ;;  %v779_v49 = vor.u32 %v874_v43, %v778_v42  ;;  %v751_v50 = vor.u32 %v865_v44, %v748_v45  ;;  %v754_v52 = vld [vmem:[%s1060_s25 + $0x30] sm:$0xf]  ;;  %v868_v53 = vld [vmem:[%s1060_s25 + $0x34] sm:$0xf0] }
  0x1d   : > { %527 = vmatpush.bf16.msra.mxu1 %v889_v7  ;;  %904 = vmatpush.bf16.msra.mxu3 %v889_v7  ;;  %v783_v51 = vor.u32 %v873_v46, %v780_v47  ;;  %v786_v54 = vld [vmem:[%s1060_s25 + $0x70] sm:$0xf]  ;;  %v876_v55 = vld [vmem:[%s1060_s25 + $0x74] sm:$0xf0]  ;;  %v867_v56 = vld [vmem:[%s1060_s25 + $0x34] sm:$0xf]  ;;  %v755_v60 = vor.u32 %v868_v53, %v754_v52 }
  0x1e   : > { %v756_v57 = vld [vmem:[%s1060_s25 + $0x38] sm:$0xf0]  ;;  %v875_v58 = vld [vmem:[%s1060_s25 + $0x74] sm:$0xf]  ;;  %v787_v61 = vor.u32 %v876_v55, %v786_v54  ;;  %v1102_v0 = vld [vmem:[%s236_s19] ss:$0 sm:$0xff] }
  0x1f   : > { %v788_v59 = vld [vmem:[%s1060_s25 + $0x78] sm:$0xf0]  ;;  %v759_v62 = vor.u32 %v867_v56, %v756_v57 }
  0x20   : > { %479 = vmatpush.bf16.msra.mxu0 %v880_v8  ;;  %897 = vmatpush.bf16.msra.mxu2 %v880_v8  ;;  %v791_v63 = vor.u32 %v875_v58, %v788_v59 }
  0x21   : > { %528 = vmatpush.bf16.msra.mxu1 %v888_v9  ;;  %905 = vmatpush.bf16.msra.mxu3 %v888_v9 }
  0x24   : > { %480 = vmatpush.bf16.msra.mxu0 %v879_v10  ;;  %898 = vmatpush.bf16.msra.mxu2 %v879_v10 }
  0x25   : > { %529 = vmatpush.bf16.msra.mxu1 %v887_v11  ;;  %906 = vmatpush.bf16.msra.mxu3 %v887_v11 }
  0x28   : > { %481 = vmatpush.bf16.msra.mxu0 %v878_v12  ;;  %899 = vmatpush.bf16.msra.mxu2 %v878_v12 }
  0x29   : > { %530 = vmatpush.bf16.msra.mxu1 %v886_v13  ;;  %907 = vmatpush.bf16.msra.mxu3 %v886_v13 }
  0x2c   : > { %482 = vmatpush.bf16.msra.mxu0 %v877_v14  ;;  %900 = vmatpush.bf16.msra.mxu2 %v877_v14 }
  0x2d   : > { %531 = vmatpush.bf16.msra.mxu1 %v885_v15  ;;  %908 = vmatpush.bf16.msra.mxu3 %v885_v15 }
  0x2f   : > { %483 = vmatmul.bf16.vlgmr.msra.gmra.mxu0 %v731_v24  ;;  %503 = vmatmul.bf16.vlgmr.msra.gmra.mxu2 %v763_v25 }
  0x30   : > { %532 = vmatmul.bf16.vlgmr.msra.gmra.mxu1 %v735_v26  ;;  %552 = vmatmul.bf16.vlgmr.msra.gmra.mxu3 %v767_v27 }
  0x3f   : > { %488 = vmatmul.bf16.gmra.mxu0 %v739_v36  ;;  %508 = vmatmul.bf16.gmra.mxu2 %v771_v37 }
  0x40   : > { %537 = vmatmul.bf16.gmra.mxu1 %v743_v38  ;;  %557 = vmatmul.bf16.gmra.mxu3 %v775_v39 }
  0x4f   : > { %493 = vmatmul.bf16.gmra.mxu0 %v747_v48  ;;  %513 = vmatmul.bf16.gmra.mxu2 %v779_v49 }
  0x50   : > { %542 = vmatmul.bf16.gmra.mxu1 %v751_v50  ;;  %562 = vmatmul.bf16.gmra.mxu3 %v783_v51 }
  0x5f   : > { %498 = vmatmul.bf16.gmra.mxu0 %v755_v60  ;;  %518 = vmatmul.bf16.gmra.mxu2 %v787_v61 }
  0x60   : > { %547 = vmatmul.bf16.gmra.mxu1 %v759_v62  ;;  %567 = vmatmul.bf16.gmra.mxu3 %v791_v63 }
  0xac   : > { %v484_v1 = vpop.f32.mrf.mxu0 }
  0xad   : > { %v485_v2 = vadd.f32 %v1102_v0, %v484_v1  ;;  %v533_v3 = vpop.f32.mrf.mxu1 }
  0xaf   : > { %v534_v4 = vadd.f32 %v533_v3, %v485_v2 }
  0xb1   : > { %934 = vtanh.f32 %v534_v4 }
  0xb2   : > { %v504_v5 = vpop.f32.mrf.mxu2 }
  0xb3   : > { %v505_v6 = vadd.f32 %v1102_v0, %v504_v5  ;;  %v553_v7 = vpop.f32.mrf.mxu3 }
  0xb4   : > { %v486_v8 = vpop.f32.mrf.mxu0 }
  0xb5   : > { %v554_v9 = vadd.f32 %v553_v7, %v505_v6  ;;  %v487_v10 = vadd.f32 %v1102_v0, %v486_v8  ;;  %v535_v11 = vpop.f32.mrf.mxu1 }
  0xb7   : > { %v935_v12 = vpop.eup %934  ;;  %936 = vtanh.f32 %v554_v9  ;;  %v536_v13 = vadd.f32 %v535_v11, %v487_v10 }
  0xb8   : > { %590 = vst.msk [vmem:[%s1110_s30] sm:$0xff] %vm589_vm0, %v935_v12 }
  0xb9   : > { %938 = vtanh.f32 %v536_v13 }
  0xba   : > { %v506_v14 = vpop.f32.mrf.mxu2 }
  0xbb   : > { %v507_v15 = vadd.f32 %v1102_v0, %v506_v14  ;;  %v555_v16 = vpop.f32.mrf.mxu3 }
  0xbc   : > { %v489_v17 = vpop.f32.mrf.mxu0 }
  0xbd   : > { %v937_v18 = vpop.eup %936  ;;  %v556_v19 = vadd.f32 %v555_v16, %v507_v15  ;;  %v490_v20 = vadd.f32 %v1102_v0, %v489_v17  ;;  %v538_v21 = vpop.f32.mrf.mxu1 }
  0xbe   : > { %598 = vst.msk [vmem:[%s1110_s30 + $0x40] sm:$0xff] %vm589_vm0, %v937_v18 }
  0xbf   : > { %v939_v22 = vpop.eup %938  ;;  %940 = vtanh.f32 %v556_v19  ;;  %v539_v23 = vadd.f32 %v538_v21, %v490_v20 }
  0xc0   : > { %591 = vst.msk [vmem:[%s1110_s30 + $0x8] sm:$0xff] %vm589_vm0, %v939_v22 }
  0xc1   : > { %942 = vtanh.f32 %v539_v23 }
  0xc2   : > { %v509_v24 = vpop.f32.mrf.mxu2 }
  0xc3   : > { %v510_v25 = vadd.f32 %v1102_v0, %v509_v24  ;;  %v558_v26 = vpop.f32.mrf.mxu3 }
  0xc4   : > { %v491_v27 = vpop.f32.mrf.mxu0 }
  0xc5   : > { %v941_v28 = vpop.eup %940  ;;  %v559_v29 = vadd.f32 %v558_v26, %v510_v25  ;;  %v492_v30 = vadd.f32 %v1102_v0, %v491_v27  ;;  %v540_v31 = vpop.f32.mrf.mxu1 }
  0xc6   : > { %599 = vst.msk [vmem:[%s1110_s30 + $0x48] sm:$0xff] %vm589_vm0, %v941_v28 }
  0xc7   : > { %v943_v32 = vpop.eup %942  ;;  %944 = vtanh.f32 %v559_v29  ;;  %v541_v33 = vadd.f32 %v540_v31, %v492_v30 }
  0xc8   : > { %592 = vst.msk [vmem:[%s1110_s30 + $0x10] sm:$0xff] %vm589_vm0, %v943_v32 }
  0xc9   : > { %946 = vtanh.f32 %v541_v33 }
  0xca   : > { %v511_v34 = vpop.f32.mrf.mxu2 }
  0xcb   : > { %v512_v35 = vadd.f32 %v1102_v0, %v511_v34  ;;  %v560_v36 = vpop.f32.mrf.mxu3 }
  0xcc   : > { %v494_v37 = vpop.f32.mrf.mxu0 }
  0xcd   : > { %v945_v38 = vpop.eup %944  ;;  %v561_v39 = vadd.f32 %v560_v36, %v512_v35  ;;  %v495_v40 = vadd.f32 %v1102_v0, %v494_v37  ;;  %v543_v41 = vpop.f32.mrf.mxu1 }
  0xce   : > { %600 = vst.msk [vmem:[%s1110_s30 + $0x50] sm:$0xff] %vm589_vm0, %v945_v38 }
  0xcf   : > { %v947_v42 = vpop.eup %946  ;;  %948 = vtanh.f32 %v561_v39  ;;  %v544_v43 = vadd.f32 %v543_v41, %v495_v40 }
  0xd0   : > { %593 = vst.msk [vmem:[%s1110_s30 + $0x18] sm:$0xff] %vm589_vm0, %v947_v42 }
  0xd1   : > { %950 = vtanh.f32 %v544_v43 }
  0xd2   : > { %v514_v44 = vpop.f32.mrf.mxu2 }
  0xd3   : > { %v515_v45 = vadd.f32 %v1102_v0, %v514_v44  ;;  %v563_v46 = vpop.f32.mrf.mxu3 }
  0xd4   : > { %v496_v47 = vpop.f32.mrf.mxu0 }
  0xd5   : > { %v949_v48 = vpop.eup %948  ;;  %v564_v49 = vadd.f32 %v563_v46, %v515_v45  ;;  %v497_v50 = vadd.f32 %v1102_v0, %v496_v47  ;;  %v545_v51 = vpop.f32.mrf.mxu1 }
  0xd6   : > { %601 = vst.msk [vmem:[%s1110_s30 + $0x58] sm:$0xff] %vm589_vm0, %v949_v48 }
  0xd7   : > { %v951_v52 = vpop.eup %950  ;;  %952 = vtanh.f32 %v564_v49  ;;  %v546_v53 = vadd.f32 %v545_v51, %v497_v50 }
  0xd8   : > { %594 = vst.msk [vmem:[%s1110_s30 + $0x20] sm:$0xff] %vm589_vm0, %v951_v52 }
  0xd9   : > { %954 = vtanh.f32 %v546_v53 }
  0xda   : > { %v516_v54 = vpop.f32.mrf.mxu2 }
  0xdb   : > { %v517_v55 = vadd.f32 %v1102_v0, %v516_v54  ;;  %v565_v56 = vpop.f32.mrf.mxu3 }
  0xdc   : > { %v499_v57 = vpop.f32.mrf.mxu0 }
  0xdd   : > { %v953_v58 = vpop.eup %952  ;;  %v566_v59 = vadd.f32 %v565_v56, %v517_v55  ;;  %v500_v60 = vadd.f32 %v1102_v0, %v499_v57  ;;  %v548_v61 = vpop.f32.mrf.mxu1 }
  0xde   : > { %602 = vst.msk [vmem:[%s1110_s30 + $0x60] sm:$0xff] %vm589_vm0, %v953_v58 }
  0xdf   : > { %v955_v62 = vpop.eup %954  ;;  %956 = vtanh.f32 %v566_v59  ;;  %v549_v63 = vadd.f32 %v548_v61, %v500_v60 }
  0xe0   : > { %595 = vst.msk [vmem:[%s1110_s30 + $0x28] sm:$0xff] %vm589_vm0, %v955_v62 }
  0xe1   : > { %958 = vtanh.f32 %v549_v63 }
  0xe2   : > { %v519_v1 = vpop.f32.mrf.mxu2 }
  0xe3   : > { %v520_v2 = vadd.f32 %v1102_v0, %v519_v1  ;;  %v568_v3 = vpop.f32.mrf.mxu3 }
  0xe4   : > { %v501_v4 = vpop.f32.mrf.mxu0 }
  0xe5   : > { %v957_v5 = vpop.eup %956  ;;  %v569_v6 = vadd.f32 %v568_v3, %v520_v2  ;;  %v502_v7 = vadd.f32 %v1102_v0, %v501_v4  ;;  %v550_v8 = vpop.f32.mrf.mxu1 }
  0xe6   : > { %603 = vst.msk [vmem:[%s1110_s30 + $0x68] sm:$0xff] %vm589_vm0, %v957_v5 }
  0xe7   : > { %v959_v9 = vpop.eup %958  ;;  %960 = vtanh.f32 %v569_v6  ;;  %v551_v10 = vadd.f32 %v550_v8, %v502_v7 }
  0xe8   : > { %596 = vst.msk [vmem:[%s1110_s30 + $0x30] sm:$0xff] %vm589_vm0, %v959_v9 }
  0xe9   : > { %962 = vtanh.f32 %v551_v10 }
  0xea   : > { %v521_v11 = vpop.f32.mrf.mxu2 }
  0xeb   : > { %v522_v12 = vadd.f32 %v1102_v0, %v521_v11  ;;  %v570_v13 = vpop.f32.mrf.mxu3 }
  0xed   : > { %v961_v14 = vpop.eup %960  ;;  %v571_v15 = vadd.f32 %v570_v13, %v522_v12 }
  0xee   : > { %604 = vst.msk [vmem:[%s1110_s30 + $0x70] sm:$0xff] %vm589_vm0, %v961_v14 }
  0xef   : > { %v963_v16 = vpop.eup %962  ;;  %964 = vtanh.f32 %v571_v15 }
  0xf0   : > { %597 = vst.msk [vmem:[%s1110_s30 + $0x38] sm:$0xff] %vm589_vm0, %v963_v16 }
  0xf5   : > { %v965_v17 = vpop.eup %964 }
  0xf6   : > { %605 = vst.msk [vmem:[%s1110_s30 + $0x78] sm:$0xff] %vm589_vm0, %v965_v17 }
  0xf7 PF: > { %s13_s14 = sadd.s32 1, %s988_s14   ;;  %s1171_s12 = smov %s984_s13 }
  0xf8   : > { %p10_p5 = scmp.ge.s32.totalorder %s13_s14, 6   ;;  %s1172_s13 = smov %s1174_s15 }
  0xfa   :  { %12 = sbr.rel (!%p10_p5) target bundleno = 2 (0x2), region = 68 }

</bundles_post_ra>
